<compile_context>
chip_gen: v7x
topology: tpu7x:2x2x1
jax: 0.10.0
libtpu: 0.0.40
codegen_flags: <defaults>
</compile_context>

<pallas_src>
import numpy as np

import jax
import jax.numpy as jnp
from jax import lax
from jax.experimental import pallas as pl
from jax.experimental.pallas import tpu as pltpu

EPS = 1e-5


def _round_up(a, b):
    return (a + b - 1) // b * b


# ---------------------------------------------------------------------------
# Pallas kernel: full encoder (all augmentation variants) for a tile of `bt`
# samples.  All weights have constant index maps (VMEM-resident).
# ---------------------------------------------------------------------------
def _encoder_kernel(x_ref,    # (bt, Cin*64)          raw image, NCHW-flattened
                    w1_ref,   # (A, Cin*64, 4*9*C0)   scattered conv1 * BN1-scale, per aug
                    t1_ref,   # (1, 9*C0)             BN1 shift (same for all members)
                    w2_ref,   # (A*9*C0, A*C1)        block-diag conv2 * BN2-scale
                    t2_ref,   # (1, A*C1)             BN2 shift
                    w3_ref,   # (A*C1, Lp)            block-diag 1x1 conv3
                    b3_ref,   # (1, Lp)
                    out_ref): # (bt, Lp)
    x = x_ref[...]
    t1 = t1_ref[...]
    A = w1_ref.shape[0]
    C9 = t1_ref.shape[-1]                       # 9 * C0

    pooled = []
    for a in range(A):                          # static unroll, A = augment + 1
        # conv1 for all 4 pool members x 9 pooled positions in one matmul.
        z = jnp.dot(x, w1_ref[a], preferred_element_type=jnp.float32)   # (bt, 4*C9)
        # MaxPool(2, 2): 3 full-width maxes over the 4 contiguous member slabs.
        m = jnp.maximum(jnp.maximum(z[:, 0 * C9:1 * C9], z[:, 1 * C9:2 * C9]),
                        jnp.maximum(z[:, 2 * C9:3 * C9], z[:, 3 * C9:4 * C9]))
        # BN1 shift hoisted after the max (exact); ReLU commutes with max.
        pooled.append(jnp.maximum(m + t1, 0.0))

    p = pooled[0] if A == 1 else jnp.concatenate(pooled, axis=-1)       # (bt, A*C9)

    # conv2 (3x3 over the pooled 3x3 map -> 1x1) for all variants at once.
    h2 = jnp.dot(p, w2_ref[...], preferred_element_type=jnp.float32)    # (bt, A*C1)
    h2 = jnp.maximum(h2 + t2_ref[...], 0.0)

    # conv3 (1x1) for all variants; single lane-dense full-width store.
    out_ref[...] = (jnp.dot(h2, w3_ref[...], preferred_element_type=jnp.float32)
                    + b3_ref[...])


# ---------------------------------------------------------------------------
# Wrapper: batch tiling + single fused pallas_call.
# ---------------------------------------------------------------------------
def encode(x_nchw, kp, block_b=512):
    """x: (N, Cin, 8, 8) f32 -> (N, A, latent) f32.  Variant 0 is the identity."""
    N, Cin, H, W = x_nchw.shape
    assert (H, W) == (8, 8), "patch_size=8 path"
    A = kp["A"]
    L = kp["latent_dim"]
    K = kp["w1"].shape[1]
    C36 = kp["w1"].shape[2]
    C9 = kp["t1"].shape[1]
    AC9, AC1 = kp["w2"].shape
    Lp = kp["w3"].shape[1]
    assert K == Cin * H * W

    x_flat = x_nchw.reshape(N, K)               # free reshape (NCHW is row-major)

    # Evenly-filled grid steps; pad the batch only up to a multiple of 8.
    N8 = _round_up(max(N, 1), 8)
    steps = max(pl.cdiv(N8, block_b), 1)
    if steps == 1 and N8 >= 16:
        steps = 2                               # let megacore split the batch (v7x)
    bt = _round_up(pl.cdiv(N8, steps), 8)
    padded = bt * steps
    if padded != N:
        x_flat = jnp.pad(x_flat, ((0, padded - N), (0, 0)))

    out = pl.pallas_call(
        _encoder_kernel,
        out_shape=jax.ShapeDtypeStruct((padded, Lp), jnp.float32),
        grid_spec=pltpu.PrefetchScalarGridSpec(
            num_scalar_prefetch=0,
            grid=(steps,),
            in_specs=[
                pl.BlockSpec((bt, K), lambda n: (n, 0)),
                pl.BlockSpec((A, K, C36), lambda n: (0, 0, 0)),
                pl.BlockSpec((1, C9), lambda n: (0, 0)),
                pl.BlockSpec((AC9, AC1), lambda n: (0, 0)),
                pl.BlockSpec((1, AC1), lambda n: (0, 0)),
                pl.BlockSpec((AC1, Lp), lambda n: (0, 0)),
                pl.BlockSpec((1, Lp), lambda n: (0, 0)),
            ],
            out_specs=pl.BlockSpec((bt, Lp), lambda n: (n, 0)),
        ),
        compiler_params=pltpu.CompilerParams(dimension_semantics=("parallel",)),
    )(x_flat, kp["w1"], kp["t1"], kp["w2"], kp["t2"], kp["w3"], kp["b3"])

    return out[:N, :A * L].reshape(N, A, L)


# ---------------------------------------------------------------------------
# Parameters (PyTorch shapes) + kernel-layout packing / BN folding.
# ---------------------------------------------------------------------------
def init_params(key, cin, c0, c1, latent_dim):
    ks = jax.random.split(key, 16)
    nrm = lambda k, s, sc=0.1: sc * jax.random.normal(k, s, jnp.float32)
    return dict(
        conv1_w=nrm(ks[0], (c0, cin, 3, 3)), conv1_b=nrm(ks[1], (c0,)),
        bn1_g=1.0 + nrm(ks[2], (c0,)), bn1_b=nrm(ks[3], (c0,)),
        bn1_m=nrm(ks[4], (c0,)), bn1_v=1.0 + jnp.abs(nrm(ks[5], (c0,))),
        conv2_w=nrm(ks[6], (c1, c0, 3, 3)), conv2_b=nrm(ks[7], (c1,)),
        bn2_g=1.0 + nrm(ks[8], (c1,)), bn2_b=nrm(ks[9], (c1,)),
        bn2_m=nrm(ks[10], (c1,)), bn2_v=1.0 + jnp.abs(nrm(ks[11], (c1,))),
        conv3_w=nrm(ks[12], (latent_dim, c1, 1, 1)), conv3_b=nrm(ks[13], (latent_dim,)),
    )


def pack_params(raw, cin, c0, c1, latent_dim, shifts, H=8, W=8):
    """Fold biases + eval-mode BN into weights/shifts and lay them out for the kernel.

    `shifts` is a list of (dy, dx) zero-filled translations; each becomes a conv1
    weight slab so the augmentation is applied inside the kernel for free.
    """
    A = len(shifts)
    K = cin * H * W
    C9 = 9 * c0

    s1j = raw["bn1_g"] / jnp.sqrt(raw["bn1_v"] + EPS)
    t1j = raw["bn1_b"] + s1j * (raw["conv1_b"] - raw["bn1_m"])
    s2j = raw["bn2_g"] / jnp.sqrt(raw["bn2_v"] + EPS)
    t2j = raw["bn2_b"] + s2j * (raw["conv2_b"] - raw["bn2_m"])
    s1, t1, s2, t2 = map(np.asarray, (s1j, t1j, s2j, t2j))

    # conv1 scattered over raw NCHW pixels: columns ordered
    # (member-major, pooled-pos, out-channel); BN1 scale folded in; each
    # augmentation's zero-filled translation folded into its own slab.
    w1c = np.asarray(raw["conv1_w"])                         # (c0, cin, 3, 3)
    w1 = np.zeros((A, K, 4 * C9), np.float32)
    for a, (dy, dx) in enumerate(shifts):
        for m in range(4):
            my, mx = divmod(m, 2)
            for i in range(3):
                for j in range(3):
                    col = (m * 9 + i * 3 + j) * c0
                    for ky in range(3):
                        for kx in range(3):
                            sy = 2 * i + my + ky - dy
                            sx = 2 * j + mx + kx - dx
                            if 0 <= sy < H and 0 <= sx < W:
                                for c in range(cin):
                                    row = c * H * W + sy * W + sx
                                    w1[a, row, col:col + c0] += w1c[:, c, ky, kx] * s1

    # conv2 over the pooled 3x3 map as one matmul; BN2 scale folded in;
    # block-diagonal over the A variants.
    w2_base = (np.transpose(np.asarray(raw["conv2_w"]), (2, 3, 1, 0))
               .reshape(9 * c0, c1) * s2[None, :])
    w2 = np.zeros((A * C9, A * c1), np.float32)
    for a in range(A):
        w2[a * C9:(a + 1) * C9, a * c1:(a + 1) * c1] = w2_base

    # conv3 (1x1): the A latent vectors are lane-concatenated and padded to a
    # multiple of 128 so the final store is a full-width vst.
    lp = _round_up(A * latent_dim, 128)
    w3_base = np.asarray(raw["conv3_w"]).reshape(latent_dim, c1).T    # (c1, L)
    b3_base = np.asarray(raw["conv3_b"])
    w3 = np.zeros((A * c1, lp), np.float32)
    b3 = np.zeros((1, lp), np.float32)
    for a in range(A):
        w3[a * c1:(a + 1) * c1, a * latent_dim:(a + 1) * latent_dim] = w3_base
        b3[0, a * latent_dim:(a + 1) * latent_dim] = b3_base

    return dict(
        w1=jnp.asarray(w1),
        t1=jnp.asarray(np.tile(t1, 9)[None, :]),       # (1, 9*c0)
        w2=jnp.asarray(w2),
        t2=jnp.asarray(np.tile(t2, A)[None, :]),       # (1, A*c1)
        w3=jnp.asarray(w3),
        b3=jnp.asarray(b3),
        A=A, latent_dim=latent_dim,
    )


def aug_shifts(augment):
    # Identity + `augment` deterministic zero-filled translations.
    # TODO(synk): torchvision's random rotate/affine/resize augmentation (host
    # RNG + interpolation) has no clean Pallas equivalent; deterministic
    # integer translations (folded into the conv1 weights) stand in for it.
    return [(0, 0)] + [((k % 3) - 1, ((k + 1) % 3) - 1) for k in range(augment)]


# ---------------------------------------------------------------------------
# Forward: lat = model(x); lat_aug = [model(x_) for x_ in [x] + augmented].
# All (augment+1) applications share ONE pallas_call; x is read from HBM once.
# ---------------------------------------------------------------------------
def forward(x, kp_train, kp_eval, is_training=True, block_b=512):
    N = x.shape[0]
    if not is_training:
        lat = encode(x, kp_eval, block_b)[:, 0]
        return lat.reshape(N, -1, 1, 1)
    lat_all = encode(x, kp_train, block_b)                    # (N, A, L)
    lat = lat_all[:, 0].reshape(N, -1, 1, 1)
    lat_aug = [lat_all[:, a].reshape(N, -1, 1, 1) for a in range(kp_train["A"])]
    return lat, lat_aug                                       # lat_aug[0] == lat


# ---------------------------------------------------------------------------
# Test-only helpers: pure-JAX reference (eval-mode BN) + explicit translation.
# ---------------------------------------------------------------------------
def _translate(x, dy, dx):
    # zero-filled integer translation in H/W (NCHW) -- verification helper.
    N, C, H, W = x.shape
    p = jnp.pad(x, ((0, 0), (0, 0), (1, 1), (1, 1)))
    return p[:, :, 1 - dy:1 - dy + H, 1 - dx:1 - dx + W]


def reference_model(x, raw):
    dn = ("NCHW", "OIHW", "NCHW")
    hp = lax.Precision.HIGHEST
    bc = lambda v: v[None, :, None, None]

    z = lax.conv_general_dilated(x, raw["conv1_w"], (1, 1), "VALID",
                                 dimension_numbers=dn, precision=hp) + bc(raw["conv1_b"])
    z = bc(raw["bn1_g"]) * (z - bc(raw["bn1_m"])) / jnp.sqrt(bc(raw["bn1_v"]) + EPS) + bc(raw["bn1_b"])
    z = jnp.maximum(z, 0.0)
    z = lax.reduce_window(z, -jnp.inf, lax.max, (1, 1, 2, 2), (1, 1, 2, 2), "VALID")
    z = lax.conv_general_dilated(z, raw["conv2_w"], (1, 1), "VALID",
                                 dimension_numbers=dn, precision=hp) + bc(raw["conv2_b"])
    z = bc(raw["bn2_g"]) * (z - bc(raw["bn2_m"])) / jnp.sqrt(bc(raw["bn2_v"]) + EPS) + bc(raw["bn2_b"])
    z = jnp.maximum(z, 0.0)
    z = lax.conv_general_dilated(z, raw["conv3_w"], (1, 1), "VALID",
                                 dimension_numbers=dn, precision=hp) + bc(raw["conv3_b"])
    return z  # (N, L, 1, 1)


if __name__ == "__main__":
    key = jax.random.PRNGKey(0)
    kx, kb, kparam = jax.random.split(key, 3)

    # Small shapes consistent with the module: patch_size=8 => 8x8 inputs.
    N, Cin, H, W = 2, 3, 8, 8
    C0, C1, LATENT = 16, 32, 32
    AUGMENT = 3

    x = jax.random.normal(kx, (N, Cin, H, W), jnp.float32)
    raw = init_params(kparam, Cin, C0, C1, LATENT)
    shifts = aug_shifts(AUGMENT)
    kp_train = pack_params(raw, Cin, C0, C1, LATENT, shifts)
    kp_eval = pack_params(raw, Cin, C0, C1, LATENT, [(0, 0)])

    lat, lat_aug = forward(x, kp_train, kp_eval, is_training=True)
    jax.block_until_ready(lat)
    for y in lat_aug:
        jax.block_until_ready(y)

    # Correctness vs a pure-JAX reference of the PyTorch model.
    ref = reference_model(x, raw)
    assert lat.shape == (N, LATENT, 1, 1), lat.shape
    assert len(lat_aug) == AUGMENT + 1
    assert jnp.allclose(lat, ref, atol=1e-4, rtol=1e-4), float(jnp.max(jnp.abs(lat - ref)))
    assert jnp.allclose(lat_aug[0], ref, atol=1e-4, rtol=1e-4)
    # Each augmented branch == reference applied to the explicitly-translated input.
    for k, (dy, dx) in enumerate(shifts[1:], start=1):
        ref_a = reference_model(_translate(x, dy, dx), raw)
        assert jnp.allclose(lat_aug[k], ref_a, atol=1e-4, rtol=1e-4), (
            k, float(jnp.max(jnp.abs(lat_aug[k] - ref_a))))

    # Eval path (single variant).
    lat_eval = forward(x, kp_train, kp_eval, is_training=False)
    jax.block_until_ready(lat_eval)
    assert jnp.allclose(lat_eval, ref, atol=1e-4, rtol=1e-4)

    # Larger batch: exercises batch padding, the >=2-step megacore split and a
    # multi-step grid with small tiles.
    xb = jax.random.normal(kb, (20, Cin, H, W), jnp.float32)
    ref_b = reference_model(xb, raw)
    out_b = encode(xb, kp_eval)[:, 0].reshape(20, LATENT, 1, 1)              # grid=(2,)
    jax.block_until_ready(out_b)
    assert jnp.allclose(out_b, ref_b, atol=1e-4, rtol=1e-4)
    out_b2 = encode(xb, kp_eval, block_b=8)[:, 0].reshape(20, LATENT, 1, 1)  # grid=(3,)
    jax.block_until_ready(out_b2)
    assert jnp.allclose(out_b2, ref_b, atol=1e-4, rtol=1e-4)

    print("KERNEL_OK")
</pallas_src>

<mosaic_0001>
module attributes {stable_mosaic.version = 11 : i64} {
  func.func @_encoder_kernel(%arg0: i32, %arg1: memref<8x192xf32, #tpu.memory_space<vmem>>, %arg2: memref<4x192x576xf32, #tpu.memory_space<vmem>>, %arg3: memref<1x144xf32, #tpu.memory_space<vmem>>, %arg4: memref<576x128xf32, #tpu.memory_space<vmem>>, %arg5: memref<1x128xf32, #tpu.memory_space<vmem>>, %arg6: memref<128x128xf32, #tpu.memory_space<vmem>>, %arg7: memref<1x128xf32, #tpu.memory_space<vmem>>, %arg8: memref<8x128xf32, #tpu.memory_space<vmem>>) attributes {dimension_semantics = [#tpu.dimension_semantics<parallel>], iteration_bounds = array<i64: 1>, scalar_prefetch = 0 : i64, scratch_operands = 0 : i64, tpu.core_type = #tpu.core_type<tc>, window_params = [{transform_indices = @transform_0, window_bounds = array<i64: 8, 192>}, {pipeline_mode = #tpu.pipeline_mode<synchronous>, transform_indices = @transform_1, window_bounds = array<i64: 4, 192, 576>}, {pipeline_mode = #tpu.pipeline_mode<synchronous>, transform_indices = @transform_2, window_bounds = array<i64: 1, 144>}, {pipeline_mode = #tpu.pipeline_mode<synchronous>, transform_indices = @transform_3, window_bounds = array<i64: 576, 128>}, {pipeline_mode = #tpu.pipeline_mode<synchronous>, transform_indices = @transform_4, window_bounds = array<i64: 1, 128>}, {pipeline_mode = #tpu.pipeline_mode<synchronous>, transform_indices = @transform_5, window_bounds = array<i64: 128, 128>}, {pipeline_mode = #tpu.pipeline_mode<synchronous>, transform_indices = @transform_6, window_bounds = array<i64: 1, 128>}, {transform_indices = @transform_7, window_bounds = array<i64: 8, 128>}]} {
    %c0 = arith.constant 0 : index
    %c0_0 = arith.constant 0 : index
    %0 = vector.load %arg1[%c0, %c0_0] : memref<8x192xf32, #tpu.memory_space<vmem>>, vector<8x192xf32>
    %c0_1 = arith.constant 0 : index
    %c0_2 = arith.constant 0 : index
    %1 = vector.load %arg3[%c0_1, %c0_2] : memref<1x144xf32, #tpu.memory_space<vmem>>, vector<1x144xf32>
    %c0_3 = arith.constant 0 : index
    %c0_4 = arith.constant 0 : index
    %c0_5 = arith.constant 0 : index
    %2 = vector.load %arg2[%c0_3, %c0_4, %c0_5] : memref<4x192x576xf32, #tpu.memory_space<vmem>>, vector<1x192x576xf32>
    %3 = vector.shape_cast %2 : vector<1x192x576xf32> to vector<192x576xf32>
    %cst = arith.constant dense<0.000000e+00> : vector<8x576xf32>
    %4 = tpu.matmul %0, %3, %cst {dimension_numbers = #tpu.dot_dimension_numbers<[1], [0], [0], [1], [0, 0, 1, 1], [], []>} : vector<8x192xf32>, vector<192x576xf32>, vector<8x576xf32> -> vector<8x576xf32>
    %5 = vector.extract_strided_slice %4 {offsets = [0, 0], sizes = [8, 144], strides = [1, 1]} : vector<8x576xf32> to vector<8x144xf32>
    %6 = vector.extract_strided_slice %4 {offsets = [0, 144], sizes = [8, 144], strides = [1, 1]} : vector<8x576xf32> to vector<8x144xf32>
    %7 = arith.maximumf %5, %6 : vector<8x144xf32>
    %8 = vector.extract_strided_slice %4 {offsets = [0, 288], sizes = [8, 144], strides = [1, 1]} : vector<8x576xf32> to vector<8x144xf32>
    %9 = vector.extract_strided_slice %4 {offsets = [0, 432], sizes = [8, 144], strides = [1, 1]} : vector<8x576xf32> to vector<8x144xf32>
    %10 = arith.maximumf %8, %9 : vector<8x144xf32>
    %11 = arith.maximumf %7, %10 : vector<8x144xf32>
    %12 = vector.broadcast %1 : vector<1x144xf32> to vector<8x144xf32>
    %13 = arith.addf %11, %12 : vector<8x144xf32>
    %cst_6 = arith.constant 0.000000e+00 : f32
    %14 = vector.broadcast %cst_6 : f32 to vector<8x144xf32>
    %15 = arith.maximumf %13, %14 : vector<8x144xf32>
    %c1 = arith.constant 1 : index
    %c0_7 = arith.constant 0 : index
    %c0_8 = arith.constant 0 : index
    %16 = vector.load %arg2[%c1, %c0_7, %c0_8] : memref<4x192x576xf32, #tpu.memory_space<vmem>>, vector<1x192x576xf32>
    %17 = vector.shape_cast %16 : vector<1x192x576xf32> to vector<192x576xf32>
    %cst_9 = arith.constant dense<0.000000e+00> : vector<8x576xf32>
    %18 = tpu.matmul %0, %17, %cst_9 {dimension_numbers = #tpu.dot_dimension_numbers<[1], [0], [0], [1], [0, 0, 1, 1], [], []>} : vector<8x192xf32>, vector<192x576xf32>, vector<8x576xf32> -> vector<8x576xf32>
    %19 = vector.extract_strided_slice %18 {offsets = [0, 0], sizes = [8, 144], strides = [1, 1]} : vector<8x576xf32> to vector<8x144xf32>
    %20 = vector.extract_strided_slice %18 {offsets = [0, 144], sizes = [8, 144], strides = [1, 1]} : vector<8x576xf32> to vector<8x144xf32>
    %21 = arith.maximumf %19, %20 : vector<8x144xf32>
    %22 = vector.extract_strided_slice %18 {offsets = [0, 288], sizes = [8, 144], strides = [1, 1]} : vector<8x576xf32> to vector<8x144xf32>
    %23 = vector.extract_strided_slice %18 {offsets = [0, 432], sizes = [8, 144], strides = [1, 1]} : vector<8x576xf32> to vector<8x144xf32>
    %24 = arith.maximumf %22, %23 : vector<8x144xf32>
    %25 = arith.maximumf %21, %24 : vector<8x144xf32>
    %26 = vector.broadcast %1 : vector<1x144xf32> to vector<8x144xf32>
    %27 = arith.addf %25, %26 : vector<8x144xf32>
    %cst_10 = arith.constant 0.000000e+00 : f32
    %28 = vector.broadcast %cst_10 : f32 to vector<8x144xf32>
    %29 = arith.maximumf %27, %28 : vector<8x144xf32>
    %c2 = arith.constant 2 : index
    %c0_11 = arith.constant 0 : index
    %c0_12 = arith.constant 0 : index
    %30 = vector.load %arg2[%c2, %c0_11, %c0_12] : memref<4x192x576xf32, #tpu.memory_space<vmem>>, vector<1x192x576xf32>
    %31 = vector.shape_cast %30 : vector<1x192x576xf32> to vector<192x576xf32>
    %cst_13 = arith.constant dense<0.000000e+00> : vector<8x576xf32>
    %32 = tpu.matmul %0, %31, %cst_13 {dimension_numbers = #tpu.dot_dimension_numbers<[1], [0], [0], [1], [0, 0, 1, 1], [], []>} : vector<8x192xf32>, vector<192x576xf32>, vector<8x576xf32> -> vector<8x576xf32>
    %33 = vector.extract_strided_slice %32 {offsets = [0, 0], sizes = [8, 144], strides = [1, 1]} : vector<8x576xf32> to vector<8x144xf32>
    %34 = vector.extract_strided_slice %32 {offsets = [0, 144], sizes = [8, 144], strides = [1, 1]} : vector<8x576xf32> to vector<8x144xf32>
    %35 = arith.maximumf %33, %34 : vector<8x144xf32>
    %36 = vector.extract_strided_slice %32 {offsets = [0, 288], sizes = [8, 144], strides = [1, 1]} : vector<8x576xf32> to vector<8x144xf32>
    %37 = vector.extract_strided_slice %32 {offsets = [0, 432], sizes = [8, 144], strides = [1, 1]} : vector<8x576xf32> to vector<8x144xf32>
    %38 = arith.maximumf %36, %37 : vector<8x144xf32>
    %39 = arith.maximumf %35, %38 : vector<8x144xf32>
    %40 = vector.broadcast %1 : vector<1x144xf32> to vector<8x144xf32>
    %41 = arith.addf %39, %40 : vector<8x144xf32>
    %cst_14 = arith.constant 0.000000e+00 : f32
    %42 = vector.broadcast %cst_14 : f32 to vector<8x144xf32>
    %43 = arith.maximumf %41, %42 : vector<8x144xf32>
    %c3 = arith.constant 3 : index
    %c0_15 = arith.constant 0 : index
    %c0_16 = arith.constant 0 : index
    %44 = vector.load %arg2[%c3, %c0_15, %c0_16] : memref<4x192x576xf32, #tpu.memory_space<vmem>>, vector<1x192x576xf32>
    %45 = vector.shape_cast %44 : vector<1x192x576xf32> to vector<192x576xf32>
    %cst_17 = arith.constant dense<0.000000e+00> : vector<8x576xf32>
    %46 = tpu.matmul %0, %45, %cst_17 {dimension_numbers = #tpu.dot_dimension_numbers<[1], [0], [0], [1], [0, 0, 1, 1], [], []>} : vector<8x192xf32>, vector<192x576xf32>, vector<8x576xf32> -> vector<8x576xf32>
    %47 = vector.extract_strided_slice %46 {offsets = [0, 0], sizes = [8, 144], strides = [1, 1]} : vector<8x576xf32> to vector<8x144xf32>
    %48 = vector.extract_strided_slice %46 {offsets = [0, 144], sizes = [8, 144], strides = [1, 1]} : vector<8x576xf32> to vector<8x144xf32>
    %49 = arith.maximumf %47, %48 : vector<8x144xf32>
    %50 = vector.extract_strided_slice %46 {offsets = [0, 288], sizes = [8, 144], strides = [1, 1]} : vector<8x576xf32> to vector<8x144xf32>
    %51 = vector.extract_strided_slice %46 {offsets = [0, 432], sizes = [8, 144], strides = [1, 1]} : vector<8x576xf32> to vector<8x144xf32>
    %52 = arith.maximumf %50, %51 : vector<8x144xf32>
    %53 = arith.maximumf %49, %52 : vector<8x144xf32>
    %54 = vector.broadcast %1 : vector<1x144xf32> to vector<8x144xf32>
    %55 = arith.addf %53, %54 : vector<8x144xf32>
    %cst_18 = arith.constant 0.000000e+00 : f32
    %56 = vector.broadcast %cst_18 : f32 to vector<8x144xf32>
    %57 = arith.maximumf %55, %56 : vector<8x144xf32>
    %58 = tpu.concatenate %15, %29, %43, %57 in 1 : vector<8x144xf32>, vector<8x144xf32>, vector<8x144xf32>, vector<8x144xf32> -> vector<8x576xf32>
    %c0_19 = arith.constant 0 : index
    %c0_20 = arith.constant 0 : index
    %59 = vector.load %arg4[%c0_19, %c0_20] : memref<576x128xf32, #tpu.memory_space<vmem>>, vector<576x128xf32>
    %cst_21 = arith.constant dense<0.000000e+00> : vector<8x128xf32>
    %60 = tpu.matmul %58, %59, %cst_21 {dimension_numbers = #tpu.dot_dimension_numbers<[1], [0], [0], [1], [0, 0, 1, 1], [], []>} : vector<8x576xf32>, vector<576x128xf32>, vector<8x128xf32> -> vector<8x128xf32>
    %c0_22 = arith.constant 0 : index
    %c0_23 = arith.constant 0 : index
    %61 = vector.load %arg5[%c0_22, %c0_23] : memref<1x128xf32, #tpu.memory_space<vmem>>, vector<1x128xf32>
    %62 = vector.broadcast %61 : vector<1x128xf32> to vector<8x128xf32>
    %63 = arith.addf %60, %62 : vector<8x128xf32>
    %cst_24 = arith.constant 0.000000e+00 : f32
    %64 = vector.broadcast %cst_24 : f32 to vector<8x128xf32>
    %65 = arith.maximumf %63, %64 : vector<8x128xf32>
    %c0_25 = arith.constant 0 : index
    %c0_26 = arith.constant 0 : index
    %66 = vector.load %arg6[%c0_25, %c0_26] : memref<128x128xf32, #tpu.memory_space<vmem>>, vector<128x128xf32>
    %cst_27 = arith.constant dense<0.000000e+00> : vector<8x128xf32>
    %67 = tpu.matmul %65, %66, %cst_27 {dimension_numbers = #tpu.dot_dimension_numbers<[1], [0], [0], [1], [0, 0, 1, 1], [], []>} : vector<8x128xf32>, vector<128x128xf32>, vector<8x128xf32> -> vector<8x128xf32>
    %c0_28 = arith.constant 0 : index
    %c0_29 = arith.constant 0 : index
    %68 = vector.load %arg7[%c0_28, %c0_29] : memref<1x128xf32, #tpu.memory_space<vmem>>, vector<1x128xf32>
    %69 = vector.broadcast %68 : vector<1x128xf32> to vector<8x128xf32>
    %70 = arith.addf %67, %69 : vector<8x128xf32>
    %c0_30 = arith.constant 0 : index
    %c0_31 = arith.constant 0 : index
    %71 = vector.load %arg8[%c0_30, %c0_31] : memref<8x128xf32, #tpu.memory_space<vmem>>, vector<8x128xf32>
    tpu.vector_store %arg8[%c0_30, %c0_31], %70 {strides = array<i32>} : memref<8x128xf32, #tpu.memory_space<vmem>>, vector<8x128xf32>,
    return
  }
  func.func @transform_0(%arg0: i32) -> (i32, i32) {
    %c0_i32 = arith.constant 0 : i32
    %c0_i32_0 = arith.constant 0 : i32
    return %arg0, %c0_i32 : i32, i32
  }
  func.func @transform_1(%arg0: i32) -> (i32, i32, i32) {
    %c0_i32 = arith.constant 0 : i32
    %c0_i32_0 = arith.constant 0 : i32
    %c0_i32_1 = arith.constant 0 : i32
    %c0_i32_2 = arith.constant 0 : i32
    return %c0_i32, %c0_i32_0, %c0_i32_1 : i32, i32, i32
  }
  func.func @transform_2(%arg0: i32) -> (i32, i32) {
    %c0_i32 = arith.constant 0 : i32
    %c0_i32_0 = arith.constant 0 : i32
    %c0_i32_1 = arith.constant 0 : i32
    return %c0_i32, %c0_i32_0 : i32, i32
  }
  func.func @transform_3(%arg0: i32) -> (i32, i32) {
    %c0_i32 = arith.constant 0 : i32
    %c0_i32_0 = arith.constant 0 : i32
    %c0_i32_1 = arith.constant 0 : i32
    return %c0_i32, %c0_i32_0 : i32, i32
  }
  func.func @transform_4(%arg0: i32) -> (i32, i32) {
    %c0_i32 = arith.constant 0 : i32
    %c0_i32_0 = arith.constant 0 : i32
    %c0_i32_1 = arith.constant 0 : i32
    return %c0_i32, %c0_i32_0 : i32, i32
  }
  func.func @transform_5(%arg0: i32) -> (i32, i32) {
    %c0_i32 = arith.constant 0 : i32
    %c0_i32_0 = arith.constant 0 : i32
    %c0_i32_1 = arith.constant 0 : i32
    return %c0_i32, %c0_i32_0 : i32, i32
  }
  func.func @transform_6(%arg0: i32) -> (i32, i32) {
    %c0_i32 = arith.constant 0 : i32
    %c0_i32_0 = arith.constant 0 : i32
    %c0_i32_1 = arith.constant 0 : i32
    return %c0_i32, %c0_i32_0 : i32, i32
  }
  func.func @transform_7(%arg0: i32) -> (i32, i32) {
    %c0_i32 = arith.constant 0 : i32
    %c0_i32_0 = arith.constant 0 : i32
    return %arg0, %c0_i32 : i32, i32
  }
}

</mosaic_0001>

<bundles_post_ra>
// kernel: tpu_custom_call.1
= control target key start
LH: loop header
LB: loop body
LE: loop exit
PB: predicated region body
PF: predicated region fallthrough
CT: control target
= control target key end

     0   :  { %12 = vsyncpa [#allocation3], 0  ;;  %s3419_s0 = inlined_call_operand.hbm [shape: f32[8,192], index: 0, kind: input, shape index: {}]   ;;  %s3420_s1 = inlined_call_operand.hbm [shape: f32[4,192,576], index: 1, kind: input, shape index: {}]   ;;  %s3421_s2 = inlined_call_operand.hbm [shape: f32[1,144], index: 2, kind: input, shape index: {}]   ;;  %s3422_s3 = inlined_call_operand.hbm [shape: f32[576,128], index: 3, kind: input, shape index: {}]   ;;  %s3423_s4 = inlined_call_operand.hbm [shape: f32[1,128], index: 4, kind: input, shape index: {}]   ;;  %s3424_s5 = inlined_call_operand.hbm [shape: f32[128,128], index: 5, kind: input, shape index: {}]   ;;  %s3425_s6 = inlined_call_operand.hbm [shape: f32[1,128], index: 6, kind: input, shape index: {}]   ;;  %s3426_s7 = inlined_call_operand.hbm [shape: f32[8,128], index: 7, kind: output, shape index: {}]  }
   0x1   :  { %13 = vsyncpa [#allocation6], 0 }
   0x2   :  { %14 = vsyncpa [#allocation9], 0 }
   0x3   :  { %15 = vsyncpa [#allocation12], 0 }
   0x4   :  { %16 = vsyncpa [#allocation4], 0  ;;  %s3055_s24 = smov [#allocation5]   ;;  %s2869_s28 = scalar_lea.hbm %s3420_s1, 61440 }
   0x5   :  { %s32_s25 = sshll.u32 %s3055_s24, 4  ;;  %p2870_p0 = scmp.ne.s32.totalorder %s3420_s1, %s2869_s28  ;;  %s33_s25 = int_to_ptr.vmem [resolvable:$true] %s32_s25 }
   0x6   :  { %p2873_p1 = scmp.lt.u32.totalorder %s2869_s28, %s3420_s1 }
   0x8   :  { %p2875_p2 = pnand %p2873_p1, %p2870_p0 }
   0xa   :  { %2878 = shalt.err (!%p2875_p2)
}
   0xb   :  { %s2879_s10 = scalar_lea.vmem %s33_s25, 61440  ;;  %p2884_p4 = scmp.lt.s32.totalorder %s33_s25, %s33_s25 }
   0xc   :  { %p2880_p3 = scmp.ne.s32.totalorder %s33_s25, %s2879_s10  ;;  %p2885_p5 = scmp.lt.s32.totalorder %s2879_s10, %s2879_s10 }
   0xe   :  { %p2886_p6 = por %p2885_p5, %p2884_p4 }
  0x10   :  { %p2887_p7 = pnand %p2886_p6, %p2880_p3 }
  0x12   :  { %2890 = shalt.err (!%p2887_p7)
}
  0x13   :  { %s3056_s11 = smov 640   ;;  %s3057_s12 = smov 40  }
  0x14   :  { %38 = dma.hbm_to_vmem [thread:$0]  %s3420_s1, 61440, %s33_s25, [#allocation6], %s3056_s11, %s3056_s11, %s3057_s12  }
  0x15   :  { %s3058_s15 = smov [#allocation8]   ;;  %s2891_s19 = scalar_lea.hbm %s3422_s3, 9216 }
  0x16   :  { %s54_s16 = sshll.u32 %s3058_s15, 4  ;;  %p2892_p8 = scmp.ne.s32.totalorder %s3422_s3, %s2891_s19  ;;  %s55_s16 = int_to_ptr.vmem [resolvable:$true] %s54_s16 }
  0x17   :  { %p2895_p9 = scmp.lt.u32.totalorder %s2891_s19, %s3422_s3 }
  0x19   :  { %p2897_p10 = pnand %p2895_p9, %p2892_p8 }
  0x1b   :  { %2900 = shalt.err (!%p2897_p10)
}
  0x1c   :  { %s2901_s24 = scalar_lea.vmem %s55_s16, 9216  ;;  %p2906_p12 = scmp.lt.s32.totalorder %s55_s16, %s55_s16 }
  0x1d   :  { %p2902_p11 = scmp.ne.s32.totalorder %s55_s16, %s2901_s24  ;;  %p2907_p13 = scmp.lt.s32.totalorder %s2901_s24, %s2901_s24 }
  0x1f   :  { %p2908_p0 = por %p2907_p13, %p2906_p12 }
  0x21   :  { %p2909_p1 = pnand %p2908_p0, %p2902_p11 }
  0x23   :  { %2912 = shalt.err (!%p2909_p1)
}
  0x24   :  { %s3059_s1 = smov 128   ;;  %s3060_s25 = smov 8  }
  0x25   :  { %60 = dma.hbm_to_vmem [thread:$0]  %s3422_s3, 9216, %s55_s16, [#allocation9], %s3059_s1, %s3059_s1, %s3060_s25  }
  0x26   :  { %s3061_s28 = smov [#allocation11]   ;;  %s3062_s30 = smov [#allocation2]  }
  0x27   :  { %s76_s29 = sshll.u32 %s3061_s28, 4  ;;  %s23_s8 = sshll.u32 %s3062_s30, 4  ;;  %s77_s29 = int_to_ptr.vmem [resolvable:$true] %s76_s29  ;;  %s24_s8 = int_to_ptr.vmem [resolvable:$true] %s23_s8 }
  0x28   :  { %s2913_s11 = scalar_lea.hbm %s3424_s5, 2048 }
  0x29   :  { %p2914_p2 = scmp.ne.s32.totalorder %s3424_s5, %s2913_s11  ;;  %p2917_p3 = scmp.lt.u32.totalorder %s2913_s11, %s3424_s5 }
  0x2b   :  { %p2919_p4 = pnand %p2917_p3, %p2914_p2 }
  0x2d   :  { %2922 = shalt.err (!%p2919_p4)
}
  0x2e   :  { %s2923_s3 = scalar_lea.vmem %s77_s29, 2048  ;;  %p2928_p6 = scmp.lt.s32.totalorder %s77_s29, %s77_s29 }
  0x2f   :  { %p2924_p5 = scmp.ne.s32.totalorder %s77_s29, %s2923_s3  ;;  %p2929_p7 = scmp.lt.s32.totalorder %s2923_s3, %s2923_s3 }
  0x31   :  { %p2930_p8 = por %p2929_p7, %p2928_p6 }
  0x33   :  { %p2931_p9 = pnand %p2930_p8, %p2924_p5 }
  0x35   :  { %2934 = shalt.err (!%p2931_p9)
}
  0x36   :  { %82 = dma.hbm_to_vmem [thread:$0]  %s3424_s5, 2048, %s77_s29, [#allocation12], %s3059_s1, %s3059_s1, %s3060_s25  }
  0x37   :  { %s2935_s20 = scalar_lea.hbm %s3419_s0, 256 }
  0x38   :  { %p2936_p10 = scmp.ne.s32.totalorder %s3419_s0, %s2935_s20  ;;  %p2939_p11 = scmp.lt.u32.totalorder %s2935_s20, %s3419_s0 }
  0x3a   :  { %p2941_p12 = pnand %p2939_p11, %p2936_p10 }
  0x3c   :  { %2944 = shalt.err (!%p2941_p12)
}
  0x3d   :  { %s2945_s26 = scalar_lea.vmem %s24_s8, 256  ;;  %p2950_p0 = scmp.lt.s32.totalorder %s24_s8, %s24_s8 }
  0x3e   :  { %p2946_p13 = scmp.ne.s32.totalorder %s24_s8, %s2945_s26  ;;  %p2951_p1 = scmp.lt.s32.totalorder %s2945_s26, %s2945_s26 }
  0x40   :  { %p2952_p2 = por %p2951_p1, %p2950_p0 }
  0x42   :  { %p2953_p3 = pnand %p2952_p2, %p2946_p13 }
  0x44   :  { %2956 = shalt.err (!%p2953_p3)
}
  0x45   :  { %26 = dma.hbm_to_vmem [thread:$0]  %s3419_s0, 256, %s24_s8, [#allocation3]  }
  0x46   :  { %s3063_s25 = smov [#allocation7]   ;;  %s3064_s28 = smov [#allocation10]  }
  0x47   :  { %s45_s27 = sshll.u32 %s3063_s25, 4  ;;  %s67_s29 = sshll.u32 %s3064_s28, 4  ;;  %s46_s27 = int_to_ptr.vmem [resolvable:$true] %s45_s27  ;;  %s68_s29 = int_to_ptr.vmem [resolvable:$true] %s67_s29 }
  0x48   :  { %s2957_s10 = scalar_lea.hbm %s3421_s2, 32 }
  0x49   :  { %p2958_p4 = scmp.ne.s32.totalorder %s3421_s2, %s2957_s10  ;;  %p2961_p5 = scmp.lt.u32.totalorder %s2957_s10, %s3421_s2 }
  0x4b   :  { %p2963_p6 = pnand %p2961_p5, %p2958_p4 }
  0x4d   :  { %2966 = shalt.err (!%p2963_p6)
}
  0x4e   :  { %s2967_s0 = scalar_lea.vmem %s46_s27, 32  ;;  %p2972_p8 = scmp.lt.s32.totalorder %s46_s27, %s46_s27 }
  0x4f   :  { %p2968_p7 = scmp.ne.s32.totalorder %s46_s27, %s2967_s0  ;;  %p2973_p9 = scmp.lt.s32.totalorder %s2967_s0, %s2967_s0 }
  0x51   :  { %p2974_p10 = por %p2973_p9, %p2972_p8 }
  0x53   :  { %p2975_p11 = pnand %p2974_p10, %p2968_p7 }
  0x55   :  { %2978 = shalt.err (!%p2975_p11)
}
  0x56   :  { %48 = dma.hbm_to_vmem [thread:$0]  %s3421_s2, 32, %s46_s27, [#allocation6]  }
  0x57   :  { %s2979_s17 = scalar_lea.hbm %s3423_s4, 16 }
  0x58   :  { %p2980_p12 = scmp.ne.s32.totalorder %s3423_s4, %s2979_s17  ;;  %p2983_p13 = scmp.lt.u32.totalorder %s2979_s17, %s3423_s4 }
  0x5a   :  { %p2985_p0 = pnand %p2983_p13, %p2980_p12 }
  0x5c   :  { %2988 = shalt.err (!%p2985_p0)
}
  0x5d   :  { %s2989_s22 = scalar_lea.vmem %s68_s29, 16  ;;  %s2993_s23 = scalar_lea.vmem %s68_s29, 32 }
  0x5e   :  { %p2990_p1 = scmp.ne.s32.totalorder %s68_s29, %s2989_s22  ;;  %p2994_p2 = scmp.lt.s32.totalorder %s68_s29, %s68_s29 }
  0x5f   :  { %p2995_p3 = scmp.lt.s32.totalorder %s2993_s23, %s2989_s22 }
  0x61   :  { %p2996_p4 = por %p2995_p3, %p2994_p2 }
  0x63   :  { %p2997_p5 = pnand %p2996_p4, %p2990_p1 }
  0x65   :  { %3000 = shalt.err (!%p2997_p5)
}
  0x66   :  { %70 = dma.hbm_to_vmem [thread:$0]  %s3423_s4, 16, %s68_s29, [#allocation9]  }
  0x67   :  { %s3065_s26 = smov [#allocation13]   ;;  %s3001_s27 = scalar_lea.hbm %s3425_s6, 16 }
  0x68   :  { %s89_s5 = sshll.u32 %s3065_s26, 4  ;;  %p3002_p6 = scmp.ne.s32.totalorder %s3425_s6, %s3001_s27  ;;  %s90_s5 = int_to_ptr.vmem [resolvable:$true] %s89_s5 }
  0x69   :  { %p3005_p7 = scmp.lt.u32.totalorder %s3001_s27, %s3425_s6 }
  0x6b   :  { %p3007_p8 = pnand %p3005_p7, %p3002_p6 }
  0x6d   :  { %3010 = shalt.err (!%p3007_p8)
}
  0x6e   :  { %s3011_s11 = scalar_lea.vmem %s90_s5, 16  ;;  %s3015_s4 = scalar_lea.vmem %s90_s5, 32 }
  0x6f   :  { %p3012_p9 = scmp.ne.s32.totalorder %s90_s5, %s3011_s11  ;;  %p3016_p10 = scmp.lt.s32.totalorder %s90_s5, %s90_s5 }
  0x70   :  { %p3017_p11 = scmp.lt.s32.totalorder %s3015_s4, %s3011_s11 }
  0x72   :  { %p3018_p12 = por %p3017_p11, %p3016_p10 }
  0x74   :  { %p3019_p13 = pnand %p3018_p12, %p3012_p9 }
  0x76   :  { %3022 = shalt.err (!%p3019_p13)
}
  0x77   :  { %92 = dma.hbm_to_vmem [thread:$0]  %s3425_s6, 16, %s90_s5, [#allocation12]  }
  0x78   :  { %3045 = dma.done.wait [#allocation3], 256  }
  0x79   :  { %3046 = vsyncadd [#allocation3], 4294967040 }
  0x7a   :  { %3047 = dma.done.wait [#allocation6], 61472  }
  0x7b   :  { %3048 = vsyncadd [#allocation6], 4294905824 }
  0x7c   :  { %3049 = dma.done.wait [#allocation9], 9232  }
  0x7d   :  { %3050 = vsyncadd [#allocation9], 4294958064 }
  0x7e   :  { %3051 = dma.done.wait [#allocation12], 2064  }
  0x7f   :  { %3052 = vsyncadd [#allocation12], 4294965232  ;;  %v118_v0 = vld [vmem:[#allocation5 + $0x8] sm:$0xff]  ;;  %v123_v1 = vld [vmem:[#allocation5 + $0x30] sm:$0xff]  ;;  %vm237_vm0 = vcmask 523264   ;;  %s3067_s6 = smov 112  }
  0x80   :  { %v120_v2 = vld [vmem:[#allocation5 + $0x18] sm:$0xff]  ;;  %v2214_v3 = vpack.c.bf16 %v123_v1, %v118_v0  ;;  %v125_v4 = vld [vmem:[#allocation5 + $0x40] sm:$0xff]  ;;  %v122_v6 = vld [vmem:[#allocation5 + $0x28] sm:$0xff]  ;;  %vm459_vm1 = vcmask 916480   ;;  %s3068_s13 = smov 96   ;;  %vm482_vm2 = vcmask 785408  }
  0x81   :  { %v117_v5 = vld [vmem:[#allocation5] sm:$0xff]  ;;  %v2262_v7 = vpack.c.bf16 %v125_v4, %v120_v2  ;;  %v119_v9 = vld [vmem:[#allocation5 + $0x10] sm:$0xff]  ;;  %v124_v10 = vld [vmem:[#allocation5 + $0x38] sm:$0xff]  ;;  %s3069_s14 = smov 16   ;;  %s3070_s0 = smov 32   ;;  %vm1619_vm3 = vcmask 130048  }
  0x82   :  { %v2216_v8 = vpack.c.bf16 %v122_v6, %v117_v5  ;;  %v128_v11 = vld [vmem:[#allocation5 + $0x58] sm:$0xff]  ;;  %2215 = vmatprep.subr.bf16.mxu0 %v2214_v3  ;;  %v2264_v12 = vpack.c.bf16 %v124_v10, %v119_v9  ;;  %v133_v13 = vld [vmem:[#allocation5 + $0x80] sm:$0xff]  ;;  %v130_v14 = vld [vmem:[#allocation5 + $0x68] sm:$0xff]  ;;  %s3071_s8 = smov 48   ;;  %vm3072_vm4 = vmmov 0   ;;  %vm1629_vm5 = vcmask 261120  }
  0x83   :  { %v135_v15 = vld [vmem:[#allocation5 + $0x90] sm:$0xff]  ;;  %2263 = vmatprep.subr.bf16.mxu1 %v2262_v7  ;;  %v2218_v16 = vpack.c.bf16 %v133_v13, %v128_v11  ;;  %v132_v19 = vld [vmem:[#allocation5 + $0x78] sm:$0xff]  ;;  %v129_v20 = vld [vmem:[#allocation5 + $0x60] sm:$0xff]  ;;  %vm1639_vm6 = vcmask 392192   ;;  %s3074_s15 = smov [#allocation14]  }
  0x84   :  { %2217 = vmatpush1.bf16.msra.mxu0 %v2216_v8  ;;  %v2266_v17 = vpack.c.bf16 %v135_v15, %v130_v14  ;;  %v127_v18 = vld [vmem:[#allocation5 + $0x50] sm:$0xff]  ;;  %2265 = vmatpush1.bf16.msra.mxu1 %v2264_v12  ;;  %v134_v22 = vld [vmem:[#allocation5 + $0x88] sm:$0xff]  ;;  %v140_v27 = vld [vmem:[#allocation5 + $0xb8] sm:$0xff]  ;;  %s2037_s3 = sshll.u32 %s3074_s15, 4  ;;  %s2038_s3 = int_to_ptr.vmem [resolvable:$true] %s2037_s3 }
  0x85   :  { %v2220_v21 = vpack.c.bf16 %v132_v19, %v127_v18  ;;  %v138_v23 = vld [vmem:[#allocation5 + $0xa8] sm:$0xff]  ;;  %v143_v24 = vld [vmem:[#allocation5 + $0xd0] sm:$0xff]  ;;  %2219 = vmatprep.subr.bf16.mxu0 %v2218_v16  ;;  %v2268_v25 = vpack.c.bf16 %v134_v22, %v129_v20  ;;  %v145_v28 = vld [vmem:[#allocation5 + $0xe0] sm:$0xff]  ;;  %s3023_s16 = scalar_lea.vmem %s2038_s3, 128  ;;  %p3028_p1 = scmp.lt.s32.totalorder %s2038_s3, %s2038_s3 }
  0x86   :  { %2267 = vmatprep.subr.bf16.mxu1 %v2266_v17  ;;  %v2222_v26 = vpack.c.bf16 %v143_v24, %v138_v23  ;;  %v137_v29 = vld [vmem:[#allocation5 + $0xa0] sm:$0xff]  ;;  %v2270_v30 = vpack.c.bf16 %v145_v28, %v140_v27  ;;  %v142_v31 = vld [vmem:[#allocation5 + $0xc8] sm:$0xff]  ;;  %v139_v32 = vld [vmem:[#allocation5 + $0xb0] sm:$0xff]  ;;  %p3024_p0 = scmp.ne.s32.totalorder %s2038_s3, %s3023_s16  ;;  %p3029_p2 = scmp.lt.s32.totalorder %s3023_s16, %s3023_s16 }
  0x87   :  { %v144_v33 = vld [vmem:[#allocation5 + $0xd8] sm:$0xff]  ;;  %v2224_v34 = vpack.c.bf16 %v142_v31, %v137_v29  ;;  %v153_v36 = vld [vmem:[#allocation5 + $0x120] sm:$0xff]  ;;  %v150_v37 = vld [vmem:[#allocation5 + $0x108] sm:$0xff] }
  0x88   :  { %2221 = vmatpush1.bf16.msra.mxu0 %v2220_v21  ;;  %v148_v35 = vld [vmem:[#allocation5 + $0xf8] sm:$0xff]  ;;  %2269 = vmatpush1.bf16.msra.mxu1 %v2268_v25  ;;  %v2272_v38 = vpack.c.bf16 %v144_v33, %v139_v32  ;;  %v155_v40 = vld [vmem:[#allocation5 + $0x130] sm:$0xff]  ;;  %v149_v44 = vld [vmem:[#allocation5 + $0x100] sm:$0xff]  ;;  %p3030_p3 = por %p3029_p2, %p3028_p1 }
  0x89   :  { %2223 = vmatprep.subr.bf16.mxu0 %v2222_v26  ;;  %v2226_v39 = vpack.c.bf16 %v153_v36, %v148_v35  ;;  %v147_v41 = vld [vmem:[#allocation5 + $0xf0] sm:$0xff]  ;;  %v152_v42 = vld [vmem:[#allocation5 + $0x118] sm:$0xff]  ;;  %2271 = vmatprep.subr.bf16.mxu1 %v2270_v30  ;;  %v2274_v43 = vpack.c.bf16 %v155_v40, %v150_v37  ;;  %v154_v45 = vld [vmem:[#allocation5 + $0x128] sm:$0xff] }
  0x8a   :  { %v158_v46 = vld [vmem:[#allocation5 + $0x148] sm:$0xff]  ;;  %v163_v47 = vld [vmem:[#allocation5 + $0x170] sm:$0xff]  ;;  %v160_v48 = vld [vmem:[#allocation5 + $0x158] sm:$0xff]  ;;  %v2228_v50 = vpack.c.bf16 %v152_v42, %v147_v41  ;;  %v2276_v51 = vpack.c.bf16 %v154_v45, %v149_v44  ;;  %p3031_p4 = pnand %p3030_p3, %p3024_p0 }
  0x8b   :  { %v165_v49 = vld [vmem:[#allocation5 + $0x180] sm:$0xff]  ;;  %v2230_v52 = vpack.c.bf16 %v163_v47, %v158_v46  ;;  %v162_v54 = vld [vmem:[#allocation5 + $0x168] sm:$0xff]  ;;  %v159_v55 = vld [vmem:[#allocation5 + $0x150] sm:$0xff] }
  0x8c   :  { %2225 = vmatpush1.bf16.msra.mxu0 %v2224_v34  ;;  %2273 = vmatpush1.bf16.msra.mxu1 %v2272_v38  ;;  %v157_v53 = vld [vmem:[#allocation5 + $0x140] sm:$0xff]  ;;  %v2278_v56 = vpack.c.bf16 %v165_v49, %v160_v48  ;;  %v164_v57 = vld [vmem:[#allocation5 + $0x178] sm:$0xff]  ;;  %v170_v60 = vld [vmem:[#allocation5 + $0x1a8] sm:$0xff] }
  0x8d   :  { %2227 = vmatprep.subr.bf16.mxu0 %v2226_v39  ;;  %2275 = vmatprep.subr.bf16.mxu1 %v2274_v43  ;;  %v168_v58 = vld [vmem:[#allocation5 + $0x198] sm:$0xff]  ;;  %v173_v59 = vld [vmem:[#allocation5 + $0x1c0] sm:$0xff]  ;;  %v175_v61 = vld [vmem:[#allocation5 + $0x1d0] sm:$0xff]  ;;  %v2232_v62 = vpack.c.bf16 %v162_v54, %v157_v53  ;;  %v2280_v63 = vpack.c.bf16 %v164_v57, %v159_v55 }
  0x8e   :  { %v2234_v0 = vpack.c.bf16 %v173_v59, %v168_v58  ;;  %v167_v1 = vld [vmem:[#allocation5 + $0x190] sm:$0xff]  ;;  %v172_v2 = vld [vmem:[#allocation5 + $0x1b8] sm:$0xff]  ;;  %v169_v3 = vld [vmem:[#allocation5 + $0x1a0] sm:$0xff]  ;;  %v2282_v4 = vpack.c.bf16 %v175_v61, %v170_v60 }
  0x8f   :  { %v174_v5 = vld [vmem:[#allocation5 + $0x1c8] sm:$0xff]  ;;  %v183_v7 = vld [vmem:[#allocation5 + $0x210] sm:$0xff]  ;;  %v180_v8 = vld [vmem:[#allocation5 + $0x1f8] sm:$0xff]  ;;  %v2236_v10 = vpack.c.bf16 %v172_v2, %v167_v1 }
  0x90   :  { %2229 = vmatpush1.bf16.msra.mxu0 %v2228_v50  ;;  %2277 = vmatpush1.bf16.msra.mxu1 %v2276_v51  ;;  %v178_v6 = vld [vmem:[#allocation5 + $0x1e8] sm:$0xff]  ;;  %v185_v9 = vld [vmem:[#allocation5 + $0x220] sm:$0xff]  ;;  %v2284_v11 = vpack.c.bf16 %v174_v5, %v169_v3  ;;  %v179_v15 = vld [vmem:[#allocation5 + $0x1f0] sm:$0xff] }
  0x91   :  { %2231 = vmatprep.subr.bf16.mxu0 %v2230_v52  ;;  %2279 = vmatprep.subr.bf16.mxu1 %v2278_v56  ;;  %v2238_v12 = vpack.c.bf16 %v183_v7, %v178_v6  ;;  %v177_v13 = vld [vmem:[#allocation5 + $0x1e0] sm:$0xff]  ;;  %v182_v14 = vld [vmem:[#allocation5 + $0x208] sm:$0xff]  ;;  %v2286_v16 = vpack.c.bf16 %v185_v9, %v180_v8  ;;  %v184_v17 = vld [vmem:[#allocation5 + $0x218] sm:$0xff] }
  0x92   :  { %v188_v18 = vld [vmem:[#allocation5 + $0x238] sm:$0xff]  ;;  %v193_v19 = vld [vmem:[#allocation5 + $0x260] sm:$0xff]  ;;  %v190_v20 = vld [vmem:[#allocation5 + $0x248] sm:$0xff]  ;;  %v2240_v22 = vpack.c.bf16 %v182_v14, %v177_v13  ;;  %v2288_v23 = vpack.c.bf16 %v184_v17, %v179_v15 }
  0x93   :  { %v195_v21 = vld [vmem:[#allocation5 + $0x270] sm:$0xff]  ;;  %v2242_v24 = vpack.c.bf16 %v193_v19, %v188_v18  ;;  %v192_v26 = vld [vmem:[#allocation5 + $0x258] sm:$0xff]  ;;  %v189_v27 = vld [vmem:[#allocation5 + $0x240] sm:$0xff] }
  0x94   :  { %2233 = vmatpush1.bf16.msra.mxu0 %v2232_v62  ;;  %2281 = vmatpush1.bf16.msra.mxu1 %v2280_v63  ;;  %v187_v25 = vld [vmem:[#allocation5 + $0x230] sm:$0xff]  ;;  %v2290_v28 = vpack.c.bf16 %v195_v21, %v190_v20  ;;  %v194_v29 = vld [vmem:[#allocation5 + $0x268] sm:$0xff]  ;;  %v200_v32 = vld [vmem:[#allocation5 + $0x298] sm:$0xff] }
  0x95   :  { %2235 = vmatprep.subr.bf16.mxu0 %v2234_v0  ;;  %2283 = vmatprep.subr.bf16.mxu1 %v2282_v4  ;;  %v198_v30 = vld [vmem:[#allocation5 + $0x288] sm:$0xff]  ;;  %v203_v31 = vld [vmem:[#allocation5 + $0x2b0] sm:$0xff]  ;;  %v205_v33 = vld [vmem:[#allocation5 + $0x2c0] sm:$0xff]  ;;  %v2244_v34 = vpack.c.bf16 %v192_v26, %v187_v25  ;;  %v2292_v35 = vpack.c.bf16 %v194_v29, %v189_v27 }
  0x96   :  { %v2246_v36 = vpack.c.bf16 %v203_v31, %v198_v30  ;;  %v197_v37 = vld [vmem:[#allocation5 + $0x280] sm:$0xff]  ;;  %v202_v38 = vld [vmem:[#allocation5 + $0x2a8] sm:$0xff]  ;;  %v199_v39 = vld [vmem:[#allocation5 + $0x290] sm:$0xff]  ;;  %v2294_v40 = vpack.c.bf16 %v205_v33, %v200_v32 }
  0x97   :  { %v204_v41 = vld [vmem:[#allocation5 + $0x2b8] sm:$0xff]  ;;  %v213_v43 = vld [vmem:[#allocation5 + $0x300] sm:$0xff]  ;;  %v210_v44 = vld [vmem:[#allocation5 + $0x2e8] sm:$0xff]  ;;  %v2248_v46 = vpack.c.bf16 %v202_v38, %v197_v37 }
  0x98   :  { %2237 = vmatpush1.bf16.msra.mxu0 %v2236_v10  ;;  %2285 = vmatpush1.bf16.msra.mxu1 %v2284_v11  ;;  %v208_v42 = vld [vmem:[#allocation5 + $0x2d8] sm:$0xff]  ;;  %v215_v45 = vld [vmem:[#allocation5 + $0x310] sm:$0xff]  ;;  %v2296_v48 = vpack.c.bf16 %v204_v41, %v199_v39  ;;  %v209_v52 = vld [vmem:[#allocation5 + $0x2e0] sm:$0xff] }
  0x99   :  { %2239 = vmatprep.subr.bf16.mxu0 %v2238_v12  ;;  %2287 = vmatprep.subr.bf16.mxu1 %v2286_v16  ;;  %v3199_v47 = vld [vmem:[#allocation2 + $0x8] sm:$0xff]  ;;  %v2250_v49 = vpack.c.bf16 %v213_v43, %v208_v42  ;;  %v207_v50 = vld [vmem:[#allocation5 + $0x2d0] sm:$0xff]  ;;  %v2298_v53 = vpack.c.bf16 %v215_v45, %v210_v44  ;;  %v214_v54 = vld [vmem:[#allocation5 + $0x308] sm:$0xff] }
  0x9a   :  { %v212_v51 = vld [vmem:[#allocation5 + $0x2f8] sm:$0xff]  ;;  %v218_v55 = vld [vmem:[#allocation5 + $0x328] sm:$0xff]  ;;  %v223_v56 = vld [vmem:[#allocation5 + $0x350] sm:$0xff]  ;;  %2049 = vmatprep.mubr.msk.f32.mxu0 %vm237_vm0, %v3199_v47  ;;  %2050 = vmatprep.mubr.msk.f32.mxu1 %vm237_vm0, %v3199_v47  ;;  %v2300_v60 = vpack.c.bf16 %v214_v54, %v209_v52 }
  0x9b   :  { %v220_v57 = vld [vmem:[#allocation5 + $0x338] sm:$0xff]  ;;  %v225_v58 = vld [vmem:[#allocation5 + $0x360] sm:$0xff]  ;;  %v2252_v59 = vpack.c.bf16 %v212_v51, %v207_v50  ;;  %v2254_v61 = vpack.c.bf16 %v223_v56, %v218_v55  ;;  %v222_v63 = vld [vmem:[#allocation5 + $0x348] sm:$0xff] }
  0x9c   :  { %2241 = vmatpush1.bf16.msra.mxu0 %v2240_v22  ;;  %2289 = vmatpush1.bf16.msra.mxu1 %v2288_v23  ;;  %v217_v62 = vld [vmem:[#allocation5 + $0x320] sm:$0xff]  ;;  %v219_v0 = vld [vmem:[#allocation5 + $0x330] sm:$0xff]  ;;  %v2302_v1 = vpack.c.bf16 %v225_v58, %v220_v57  ;;  %v224_v2 = vld [vmem:[#allocation5 + $0x358] sm:$0xff] }
  0x9d   :  { %2243 = vmatprep.subr.bf16.mxu0 %v2242_v24  ;;  %2291 = vmatprep.subr.bf16.mxu1 %v2290_v28  ;;  %v228_v3 = vld [vmem:[#allocation5 + $0x378] sm:$0xff]  ;;  %v233_v4 = vld [vmem:[#allocation5 + $0x3a0] sm:$0xff]  ;;  %v230_v5 = vld [vmem:[#allocation5 + $0x388] sm:$0xff]  ;;  %v2256_v7 = vpack.c.bf16 %v222_v63, %v217_v62  ;;  %v2304_v8 = vpack.c.bf16 %v224_v2, %v219_v0  ;;  %v3066_v28 = vmov 0.0|0.0  }
  0x9e   :  { %v235_v6 = vld [vmem:[#allocation5 + $0x3b0] sm:$0xff]  ;;  %v2258_v9 = vpack.c.bf16 %v233_v4, %v228_v3  ;;  %v232_v11 = vld [vmem:[#allocation5 + $0x398] sm:$0xff]  ;;  %v229_v13 = vld [vmem:[#allocation5 + $0x380] sm:$0xff] }
  0x9f   :  { %v227_v10 = vld [vmem:[#allocation5 + $0x370] sm:$0xff]  ;;  %v2306_v12 = vpack.c.bf16 %v235_v6, %v230_v5  ;;  %v234_v14 = vld [vmem:[#allocation5 + $0x3a8] sm:$0xff]  ;;  %v121_v19 = vld [vmem:[#allocation5 + $0x20] sm:$0xff] }
  0xa0   :  { %2245 = vmatpush1.bf16.msra.mxu0 %v2244_v34  ;;  %2293 = vmatpush1.bf16.msra.mxu1 %v2292_v35  ;;  %v505_v15 = vld [vmem:[#allocation5 + $0x3c8] sm:$0xff]  ;;  %v510_v16 = vld [vmem:[#allocation5 + $0x3f0] sm:$0xff]  ;;  %v2260_v17 = vpack.c.bf16 %v232_v11, %v227_v10  ;;  %v2308_v18 = vpack.c.bf16 %v234_v14, %v229_v13  ;;  %v504_v22 = vld [vmem:[#allocation5 + $0x3c0] sm:$0xff] }
  0xa1   :  { %2247 = vmatprep.subr.bf16.mxu0 %v2246_v36  ;;  %2295 = vmatprep.subr.bf16.mxu1 %v2294_v40  ;;  %v126_v20 = vld [vmem:[#allocation5 + $0x48] sm:$0xff]  ;;  %v2346_v21 = vpack.c.bf16 %v510_v16, %v505_v15  ;;  %v515_v24 = vld [vmem:[#allocation5 + $0x418] sm:$0xff]  ;;  %v520_v25 = vld [vmem:[#allocation5 + $0x440] sm:$0xff] }
  0xa2   :  { %v509_v23 = vld [vmem:[#allocation5 + $0x3e8] sm:$0xff]  ;;  %v3205_v26 = vld [vmem:[#allocation2] sm:$0xff]  ;;  %v2311_v27 = vpack.c.bf16 %v126_v20, %v121_v19  ;;  %v136_v31 = vld [vmem:[#allocation5 + $0x98] sm:$0xff]  ;;  %v2350_v32 = vpack.c.bf16 %v520_v25, %v515_v24 }
  0xa3   :  { %v2348_v29 = vpack.c.bf16 %v509_v23, %v504_v22  ;;  %v131_v30 = vld [vmem:[#allocation5 + $0x70] sm:$0xff]  ;;  %v519_v34 = vld [vmem:[#allocation5 + $0x438] sm:$0xff]  ;;  %v525_v35 = vld [vmem:[#allocation5 + $0x468] sm:$0xff] }
  0xa4   :  { %2249 = vmatpush1.bf16.msra.mxu0 %v2248_v46  ;;  %2297 = vmatpush1.bf16.msra.mxu1 %v2296_v48  ;;  %v514_v33 = vld [vmem:[#allocation5 + $0x410] sm:$0xff]  ;;  %v2314_v37 = vpack.c.bf16 %v136_v31, %v131_v30  ;;  %v141_v39 = vld [vmem:[#allocation5 + $0xc0] sm:$0xff]  ;;  %v146_v40 = vld [vmem:[#allocation5 + $0xe8] sm:$0xff] }
  0xa5   :  { %2251 = vmatprep.subr.bf16.mxu0 %v2250_v49  ;;  %2299 = vmatprep.subr.bf16.mxu1 %v2298_v53  ;;  %v530_v36 = vld [vmem:[#allocation5 + $0x490] sm:$0xff]  ;;  %v2352_v38 = vpack.c.bf16 %v519_v34, %v514_v33  ;;  %v524_v42 = vld [vmem:[#allocation5 + $0x460] sm:$0xff]  ;;  %v529_v43 = vld [vmem:[#allocation5 + $0x488] sm:$0xff]  ;;  %v2317_v46 = vpack.c.bf16 %v146_v40, %v141_v39 }
  0xa6   :  { %v2354_v41 = vpack.c.bf16 %v530_v36, %v525_v35  ;;  %v535_v44 = vld [vmem:[#allocation5 + $0x4b8] sm:$0xff]  ;;  %v540_v45 = vld [vmem:[#allocation5 + $0x4e0] sm:$0xff]  ;;  %v2356_v48 = vpack.c.bf16 %v529_v43, %v524_v42  ;;  %v151_v49 = vld [vmem:[#allocation5 + $0x110] sm:$0xff] }
  0xa7   :  { %v156_v50 = vld [vmem:[#allocation5 + $0x138] sm:$0xff]  ;;  %v2358_v51 = vpack.c.bf16 %v540_v45, %v535_v44  ;;  %v534_v52 = vld [vmem:[#allocation5 + $0x4b0] sm:$0xff]  ;;  %v545_v54 = vld [vmem:[#allocation5 + $0x508] sm:$0xff] }
  0xa8   :  { %2253 = vmatpush1.bf16.msra.mxu0 %v2252_v59  ;;  %2301 = vmatpush1.bf16.msra.mxu1 %v2300_v60  ;;  %v539_v53 = vld [vmem:[#allocation5 + $0x4d8] sm:$0xff]  ;;  %v550_v55 = vld [vmem:[#allocation5 + $0x530] sm:$0xff]  ;;  %v2320_v56 = vpack.c.bf16 %v156_v50, %v151_v49  ;;  %v161_v58 = vld [vmem:[#allocation5 + $0x160] sm:$0xff] }
  0xa9   :  { %2255 = vmatprep.subr.bf16.mxu0 %v2254_v61  ;;  %2303 = vmatprep.subr.bf16.mxu1 %v2302_v1  ;;  %v2360_v57 = vpack.c.bf16 %v539_v53, %v534_v52  ;;  %v166_v59 = vld [vmem:[#allocation5 + $0x188] sm:$0xff]  ;;  %v2362_v60 = vpack.c.bf16 %v550_v55, %v545_v54  ;;  %v544_v61 = vld [vmem:[#allocation5 + $0x500] sm:$0xff]  ;;  %v555_v63 = vld [vmem:[#allocation5 + $0x558] sm:$0xff] }
  0xaa   :  { %v549_v62 = vld [vmem:[#allocation5 + $0x528] sm:$0xff]  ;;  %v560_v0 = vld [vmem:[#allocation5 + $0x580] sm:$0xff]  ;;  %v2323_v1 = vpack.c.bf16 %v166_v59, %v161_v58  ;;  %v171_v3 = vld [vmem:[#allocation5 + $0x1b0] sm:$0xff] }
  0xab   :  { %v2364_v2 = vpack.c.bf16 %v549_v62, %v544_v61  ;;  %v176_v4 = vld [vmem:[#allocation5 + $0x1d8] sm:$0xff]  ;;  %v2366_v5 = vpack.c.bf16 %v560_v0, %v555_v63  ;;  %v554_v6 = vld [vmem:[#allocation5 + $0x550] sm:$0xff]  ;;  %v186_v13 = vld [vmem:[#allocation5 + $0x228] sm:$0xff] }
  0xac   :  { %2257 = vmatpush1.bf16.msra.mxu0 %v2256_v7  ;;  %2305 = vmatpush1.bf16.msra.mxu1 %v2304_v8  ;;  %v559_v7 = vld [vmem:[#allocation5 + $0x578] sm:$0xff]  ;;  %v565_v8 = vld [vmem:[#allocation5 + $0x5a8] sm:$0xff]  ;;  %v2326_v10 = vpack.c.bf16 %v176_v4, %v171_v3  ;;  %v564_v15 = vld [vmem:[#allocation5 + $0x5a0] sm:$0xff] }
  0xad   :  { %2259 = vmatprep.subr.bf16.mxu0 %v2258_v9  ;;  %2307 = vmatprep.subr.bf16.mxu1 %v2306_v12  ;;  %v570_v9 = vld [vmem:[#allocation5 + $0x5d0] sm:$0xff]  ;;  %v2368_v11 = vpack.c.bf16 %v559_v7, %v554_v6  ;;  %v181_v12 = vld [vmem:[#allocation5 + $0x200] sm:$0xff]  ;;  %v569_v16 = vld [vmem:[#allocation5 + $0x5c8] sm:$0xff] }
  0xae   :  { %v2370_v14 = vpack.c.bf16 %v570_v9, %v565_v8  ;;  %v2329_v19 = vpack.c.bf16 %v186_v13, %v181_v12  ;;  %v2372_v20 = vpack.c.bf16 %v569_v16, %v564_v15  ;;  %v196_v22 = vld [vmem:[#allocation5 + $0x278] sm:$0xff]  ;;  %v574_v24 = vld [vmem:[#allocation5 + $0x5f0] sm:$0xff]  ;;  %v206_v33 = vld [vmem:[#allocation5 + $0x2c8] sm:$0xff] }
  0xaf   :  { %v579_v25 = vld [vmem:[#allocation5 + $0x618] sm:$0xff]  ;;  %v584_v35 = vld [vmem:[#allocation5 + $0x640] sm:$0xff]  ;;  %v589_v36 = vld [vmem:[#allocation5 + $0x668] sm:$0xff] }
  0xb0   :  { %2261 = vmatpush1.bf16.msra.mxu0 %v2260_v17  ;;  %2309 = vmatpush1.bf16.msra.mxu1 %v2308_v18  ;;  %v575_v17 = vld [vmem:[#allocation5 + $0x5f8] sm:$0xff]  ;;  %v580_v18 = vld [vmem:[#allocation5 + $0x620] sm:$0xff]  ;;  %v2376_v31 = vpack.c.bf16 %v579_v25, %v574_v24  ;;  %v2380_v40 = vpack.c.bf16 %v589_v36, %v584_v35  ;;  %v594_v44 = vld [vmem:[#allocation5 + $0x690] sm:$0xff] }
  0xb1   :  { %2310 = vmatprep.subr.bf16.mxu0 %v3066_v28  ;;  %2347 = vmatprep.subr.bf16.mxu1 %v2346_v21  ;;  %v191_v21 = vld [vmem:[#allocation5 + $0x250] sm:$0xff]  ;;  %v2374_v23 = vpack.c.bf16 %v580_v18, %v575_v17  ;;  %v216_v42 = vld [vmem:[#allocation5 + $0x318] sm:$0xff]  ;;  %v226_v52 = vld [vmem:[#allocation5 + $0x368] sm:$0xff] }
  0xb2   :  { %v2332_v30 = vpack.c.bf16 %v196_v22, %v191_v21  ;;  %v599_v45 = vld [vmem:[#allocation5 + $0x6b8] sm:$0xff]  ;;  %v604_v54 = vld [vmem:[#allocation5 + $0x6e0] sm:$0xff]  ;;  %v609_v55 = vld [vmem:[#allocation5 + $0x708] sm:$0xff] }
  0xb3   :  { %306 = vmatmul.mubr.f32.vlgmr.msra.gmra.mrb[0].mxu0 %v3205_v26  ;;  %377 = vmatmul.mubr.f32.vlgmr.msra.gmra.mrb[0].mxu1 %v3205_v26  ;;  %v2384_v50 = vpack.c.bf16 %v599_v45, %v594_v44  ;;  %v2388_v59 = vpack.c.bf16 %v609_v55, %v604_v54  ;;  %v236_v61 = vld [vmem:[#allocation5 + $0x3b8] sm:$0xff]  ;;  %v614_v62 = vld [vmem:[#allocation5 + $0x730] sm:$0xff]  ;;  %v508_v8 = vld [vmem:[#allocation5 + $0x3e0] sm:$0xff] }
  0xb4   :  { %2312 = vmatpush1.bf16.msra.mxu0 %v2311_v27  ;;  %2349 = vmatpush1.bf16.msra.mxu1 %v2348_v29  ;;  %v585_v27 = vld [vmem:[#allocation5 + $0x648] sm:$0xff]  ;;  %v590_v29 = vld [vmem:[#allocation5 + $0x670] sm:$0xff]  ;;  %v619_v0 = vld [vmem:[#allocation5 + $0x758] sm:$0xff] }
  0xb5   :  { %2313 = vmatprep.subr.bf16.mxu0 %v3066_v28  ;;  %2351 = vmatprep.subr.bf16.mxu1 %v2350_v32  ;;  %v201_v32 = vld [vmem:[#allocation5 + $0x2a0] sm:$0xff]  ;;  %v2378_v34 = vpack.c.bf16 %v590_v29, %v585_v27  ;;  %v2392_v4 = vpack.c.bf16 %v619_v0, %v614_v62  ;;  %v506_v6 = vld [vmem:[#allocation5 + $0x3d0] sm:$0xff]  ;;  %v511_v7 = vld [vmem:[#allocation5 + $0x3f8] sm:$0xff] }
  0xb6   :  { %2051 = vmatprep.mubr.msk.f32.mxu0 %vm237_vm0, %v3199_v47  ;;  %2052 = vmatprep.mubr.msk.f32.mxu1 %vm237_vm0, %v3199_v47  ;;  %v2335_v39 = vpack.c.bf16 %v206_v33, %v201_v32  ;;  %v513_v9 = vld [vmem:[#allocation5 + $0x408] sm:$0xff]  ;;  %v2396_v12 = vpack.c.bf16 %v511_v7, %v506_v6  ;;  %v516_v15 = vld [vmem:[#allocation5 + $0x420] sm:$0xff]  ;;  %v518_v17 = vld [vmem:[#allocation5 + $0x430] sm:$0xff] }
  0xb7   :  { %v2443_v13 = vpack.c.bf16 %v513_v9, %v508_v8  ;;  %v521_v16 = vld [vmem:[#allocation5 + $0x448] sm:$0xff]  ;;  %v523_v18 = vld [vmem:[#allocation5 + $0x458] sm:$0xff]  ;;  %v526_v24 = vld [vmem:[#allocation5 + $0x470] sm:$0xff] }
  0xb8   :  { %2315 = vmatpush1.bf16.msra.mxu0 %v2314_v37  ;;  %2353 = vmatpush1.bf16.msra.mxu1 %v2352_v38  ;;  %v595_v37 = vld [vmem:[#allocation5 + $0x698] sm:$0xff]  ;;  %v600_v38 = vld [vmem:[#allocation5 + $0x6c0] sm:$0xff]  ;;  %v2400_v21 = vpack.c.bf16 %v521_v16, %v516_v15  ;;  %v2446_v22 = vpack.c.bf16 %v523_v18, %v518_v17  ;;  %v533_v29 = vld [vmem:[#allocation5 + $0x4a8] sm:$0xff] }
  0xb9   :  { %2316 = vmatprep.subr.bf16.mxu0 %v3066_v28  ;;  %2355 = vmatprep.subr.bf16.mxu1 %v2354_v41  ;;  %v211_v41 = vld [vmem:[#allocation5 + $0x2f0] sm:$0xff]  ;;  %v2382_v43 = vpack.c.bf16 %v600_v38, %v595_v37  ;;  %v531_v25 = vld [vmem:[#allocation5 + $0x498] sm:$0xff]  ;;  %v528_v27 = vld [vmem:[#allocation5 + $0x480] sm:$0xff] }
  0xba   :  { %v2338_v49 = vpack.c.bf16 %v216_v42, %v211_v41  ;;  %v2404_v32 = vpack.c.bf16 %v531_v25, %v526_v24  ;;  %v2449_v33 = vpack.c.bf16 %v533_v29, %v528_v27  ;;  %v536_v35 = vld [vmem:[#allocation5 + $0x4c0] sm:$0xff]  ;;  %v541_v36 = vld [vmem:[#allocation5 + $0x4e8] sm:$0xff]  ;;  %v538_v37 = vld [vmem:[#allocation5 + $0x4d0] sm:$0xff] }
  0xbb   :  { %v543_v38 = vld [vmem:[#allocation5 + $0x4f8] sm:$0xff]  ;;  %v2408_v41 = vpack.c.bf16 %v541_v36, %v536_v35  ;;  %v546_v44 = vld [vmem:[#allocation5 + $0x510] sm:$0xff]  ;;  %v556_v54 = vld [vmem:[#allocation5 + $0x560] sm:$0xff] }
  0xbc   :  { %2318 = vmatpush1.bf16.msra.mxu0 %v2317_v46  ;;  %2357 = vmatpush1.bf16.msra.mxu1 %v2356_v48  ;;  %v605_v46 = vld [vmem:[#allocation5 + $0x6e8] sm:$0xff]  ;;  %v610_v48 = vld [vmem:[#allocation5 + $0x710] sm:$0xff]  ;;  %v2452_v42 = vpack.c.bf16 %v543_v38, %v538_v37  ;;  %v551_v45 = vld [vmem:[#allocation5 + $0x538] sm:$0xff] }
  0xbd   :  { %2319 = vmatprep.subr.bf16.mxu0 %v3066_v28  ;;  %2359 = vmatprep.subr.bf16.mxu1 %v2358_v51  ;;  %v221_v51 = vld [vmem:[#allocation5 + $0x340] sm:$0xff]  ;;  %v2386_v53 = vpack.c.bf16 %v610_v48, %v605_v46  ;;  %v553_v48 = vld [vmem:[#allocation5 + $0x548] sm:$0xff]  ;;  %v571_v0 = vld [vmem:[#allocation5 + $0x5d8] sm:$0xff] }
  0xbe   :  { %v2341_v58 = vpack.c.bf16 %v226_v52, %v221_v51  ;;  %v548_v46 = vld [vmem:[#allocation5 + $0x520] sm:$0xff]  ;;  %v2412_v51 = vpack.c.bf16 %v551_v45, %v546_v44  ;;  %v561_v55 = vld [vmem:[#allocation5 + $0x588] sm:$0xff]  ;;  %v586_v17 = vld [vmem:[#allocation5 + $0x650] sm:$0xff] }
  0xbf   :  { %v2455_v52 = vpack.c.bf16 %v553_v48, %v548_v46  ;;  %v576_v8 = vld [vmem:[#allocation5 + $0x600] sm:$0xff]  ;;  %v581_v9 = vld [vmem:[#allocation5 + $0x628] sm:$0xff]  ;;  %v591_v18 = vld [vmem:[#allocation5 + $0x678] sm:$0xff] }
  0xc0   :  { %2321 = vmatpush1.bf16.msra.mxu0 %v2320_v56  ;;  %2361 = vmatpush1.bf16.msra.mxu1 %v2360_v57  ;;  %v615_v56 = vld [vmem:[#allocation5 + $0x738] sm:$0xff]  ;;  %v620_v57 = vld [vmem:[#allocation5 + $0x760] sm:$0xff]  ;;  %v601_v29 = vld [vmem:[#allocation5 + $0x6c8] sm:$0xff] }
  0xc1   :  { %2322 = vmatprep.subr.bf16.mxu0 %v3066_v28  ;;  %2363 = vmatprep.subr.bf16.mxu1 %v2362_v60  ;;  %v231_v60 = vld [vmem:[#allocation5 + $0x390] sm:$0xff]  ;;  %v2390_v63 = vpack.c.bf16 %v620_v57, %v615_v56  ;;  %v563_v57 = vld [vmem:[#allocation5 + $0x598] sm:$0xff]  ;;  %v596_v27 = vld [vmem:[#allocation5 + $0x6a0] sm:$0xff] }
  0xc2   :  { %v2344_v3 = vpack.c.bf16 %v236_v61, %v231_v60  ;;  %v558_v56 = vld [vmem:[#allocation5 + $0x570] sm:$0xff]  ;;  %v2416_v60 = vpack.c.bf16 %v561_v55, %v556_v54  ;;  %v611_v38 = vld [vmem:[#allocation5 + $0x718] sm:$0xff]  ;;  %v616_v46 = vld [vmem:[#allocation5 + $0x740] sm:$0xff] }
  0xc3   :  { %v2458_v61 = vpack.c.bf16 %v563_v57, %v558_v56  ;;  %v606_v37 = vld [vmem:[#allocation5 + $0x6f0] sm:$0xff]  ;;  %v621_v48 = vld [vmem:[#allocation5 + $0x768] sm:$0xff]  ;;  %v882_v54 = vld [vmem:[#allocation5 + $0x7c0] sm:$0xff] }
  0xc4   :  { %2324 = vmatpush1.bf16.msra.mxu0 %v2323_v1  ;;  %2365 = vmatpush1.bf16.msra.mxu1 %v2364_v2  ;;  %v507_v1 = vld [vmem:[#allocation5 + $0x3d8] sm:$0xff]  ;;  %v512_v2 = vld [vmem:[#allocation5 + $0x400] sm:$0xff]  ;;  %v2440_v55 = vpack.c.bf16 %v621_v48, %v616_v46 }
  0xc5   :  { %2325 = vmatprep.subr.bf16.mxu0 %v3066_v28  ;;  %2367 = vmatprep.subr.bf16.mxu1 %v2366_v5  ;;  %v2394_v5 = vpack.c.bf16 %v512_v2, %v507_v1  ;;  %v568_v1 = vld [vmem:[#allocation5 + $0x5c0] sm:$0xff]  ;;  %v573_v2 = vld [vmem:[#allocation5 + $0x5e8] sm:$0xff]  ;;  %v921_v46 = vld [vmem:[#allocation5 + $0x8f8] sm:$0xff] }
  0xc6   :  { %v2461_v6 = vpack.c.bf16 %v573_v2, %v568_v1  ;;  %v887_v1 = vld [vmem:[#allocation5 + $0x7e8] sm:$0xff]  ;;  %v892_v2 = vld [vmem:[#allocation5 + $0x810] sm:$0xff]  ;;  %v925_v48 = vld [vmem:[#allocation5 + $0x918] sm:$0xff] }
  0xc8   :  { %2327 = vmatpush1.bf16.msra.mxu0 %v2326_v10  ;;  %2369 = vmatpush1.bf16.msra.mxu1 %v2368_v11  ;;  %v517_v10 = vld [vmem:[#allocation5 + $0x428] sm:$0xff]  ;;  %v522_v11 = vld [vmem:[#allocation5 + $0x450] sm:$0xff] }
  0xc9   :  { %2328 = vmatprep.subr.bf16.mxu0 %v3066_v28  ;;  %2371 = vmatprep.subr.bf16.mxu1 %v2370_v14  ;;  %v2398_v14 = vpack.c.bf16 %v522_v11, %v517_v10  ;;  %v578_v10 = vld [vmem:[#allocation5 + $0x610] sm:$0xff]  ;;  %v583_v11 = vld [vmem:[#allocation5 + $0x638] sm:$0xff] }
  0xca   :  { %v2464_v15 = vpack.c.bf16 %v583_v11, %v578_v10  ;;  %v891_v10 = vld [vmem:[#allocation5 + $0x808] sm:$0xff] }
  0xcb   :  { %v895_v11 = vld [vmem:[#allocation5 + $0x828] sm:$0xff] }
  0xcc   :  { %2330 = vmatpush1.bf16.msra.mxu0 %v2329_v19  ;;  %2373 = vmatpush1.bf16.msra.mxu1 %v2372_v20  ;;  %v527_v19 = vld [vmem:[#allocation5 + $0x478] sm:$0xff]  ;;  %v532_v20 = vld [vmem:[#allocation5 + $0x4a0] sm:$0xff] }
  0xcd   :  { %2331 = vmatprep.subr.bf16.mxu0 %v3066_v28  ;;  %2375 = vmatprep.subr.bf16.mxu1 %v2374_v23  ;;  %v2402_v23 = vpack.c.bf16 %v532_v20, %v527_v19  ;;  %v588_v19 = vld [vmem:[#allocation5 + $0x660] sm:$0xff]  ;;  %v593_v20 = vld [vmem:[#allocation5 + $0x688] sm:$0xff] }
  0xce   :  { %v2467_v24 = vpack.c.bf16 %v593_v20, %v588_v19  ;;  %v899_v19 = vld [vmem:[#allocation5 + $0x848] sm:$0xff]  ;;  %v896_v20 = vld [vmem:[#allocation5 + $0x830] sm:$0xff] }
  0xd0   :  { %2333 = vmatpush1.bf16.msra.mxu0 %v2332_v30  ;;  %2377 = vmatpush1.bf16.msra.mxu1 %v2376_v31  ;;  %v537_v30 = vld [vmem:[#allocation5 + $0x4c8] sm:$0xff]  ;;  %v542_v31 = vld [vmem:[#allocation5 + $0x4f0] sm:$0xff] }
  0xd1   :  { %2334 = vmatprep.subr.bf16.mxu0 %v3066_v28  ;;  %2379 = vmatprep.subr.bf16.mxu1 %v2378_v34  ;;  %v2406_v34 = vpack.c.bf16 %v542_v31, %v537_v30  ;;  %v598_v30 = vld [vmem:[#allocation5 + $0x6b0] sm:$0xff]  ;;  %v603_v31 = vld [vmem:[#allocation5 + $0x6d8] sm:$0xff] }
  0xd2   :  { %v2470_v35 = vpack.c.bf16 %v603_v31, %v598_v30  ;;  %v904_v31 = vld [vmem:[#allocation5 + $0x870] sm:$0xff] }
  0xd4   :  { %2336 = vmatpush1.bf16.msra.mxu0 %v2335_v39  ;;  %2381 = vmatpush1.bf16.msra.mxu1 %v2380_v40  ;;  %v547_v39 = vld [vmem:[#allocation5 + $0x518] sm:$0xff]  ;;  %v552_v40 = vld [vmem:[#allocation5 + $0x540] sm:$0xff] }
  0xd5   :  { %2337 = vmatprep.subr.bf16.mxu0 %v3066_v28  ;;  %2383 = vmatprep.subr.bf16.mxu1 %v2382_v43  ;;  %v2410_v43 = vpack.c.bf16 %v552_v40, %v547_v39  ;;  %v608_v39 = vld [vmem:[#allocation5 + $0x700] sm:$0xff]  ;;  %v613_v40 = vld [vmem:[#allocation5 + $0x728] sm:$0xff] }
  0xd6   :  { %v2473_v44 = vpack.c.bf16 %v613_v40, %v608_v39  ;;  %v922_v39 = vld [vmem:[#allocation5 + $0x900] sm:$0xff] }
  0xd8   :  { %2339 = vmatpush1.bf16.msra.mxu0 %v2338_v49  ;;  %2385 = vmatpush1.bf16.msra.mxu1 %v2384_v50  ;;  %v557_v49 = vld [vmem:[#allocation5 + $0x568] sm:$0xff]  ;;  %v562_v50 = vld [vmem:[#allocation5 + $0x590] sm:$0xff] }
  0xd9   :  { %2340 = vmatprep.subr.bf16.mxu0 %v3066_v28  ;;  %2387 = vmatprep.subr.bf16.mxu1 %v2386_v53  ;;  %v2414_v53 = vpack.c.bf16 %v562_v50, %v557_v49  ;;  %v618_v49 = vld [vmem:[#allocation5 + $0x750] sm:$0xff]  ;;  %v623_v50 = vld [vmem:[#allocation5 + $0x778] sm:$0xff] }
  0xda   :  { %v2476_v56 = vpack.c.bf16 %v623_v50, %v618_v49  ;;  %v930_v49 = vld [vmem:[#allocation5 + $0x940] sm:$0xff]  ;;  %v927_v50 = vld [vmem:[#allocation5 + $0x928] sm:$0xff] }
  0xdc   :  { %2342 = vmatpush1.bf16.msra.mxu0 %v2341_v58  ;;  %2389 = vmatpush1.bf16.msra.mxu1 %v2388_v59  ;;  %v567_v58 = vld [vmem:[#allocation5 + $0x5b8] sm:$0xff]  ;;  %v572_v59 = vld [vmem:[#allocation5 + $0x5e0] sm:$0xff] }
  0xdd   :  { %2343 = vmatprep.subr.bf16.mxu0 %v3066_v28  ;;  %2391 = vmatprep.subr.bf16.mxu1 %v2390_v63  ;;  %v2418_v62 = vpack.c.bf16 %v572_v59, %v567_v58  ;;  %v566_v63 = vld [vmem:[#allocation5 + $0x5b0] sm:$0xff]  ;;  %v874_v58 = vld [vmem:[#allocation5 + $0x780] sm:$0xff]  ;;  %v879_v59 = vld [vmem:[#allocation5 + $0x7a8] sm:$0xff] }
  0xe0   :  { %2345 = vmatpush1.bf16.msra.mxu0 %v2344_v3  ;;  %2393 = vmatpush1.bf16.msra.mxu1 %v2392_v4  ;;  %v577_v3 = vld [vmem:[#allocation5 + $0x608] sm:$0xff]  ;;  %v582_v4 = vld [vmem:[#allocation5 + $0x630] sm:$0xff] }
  0xe1   :  { %2395 = vmatprep.subr.bf16.mxu0 %v2394_v5  ;;  %2442 = vmatprep.subr.bf16.mxu1 %v3066_v28  ;;  %v2420_v5 = vpack.c.bf16 %v571_v0, %v566_v63  ;;  %v2422_v7 = vpack.c.bf16 %v582_v4, %v577_v3  ;;  %v885_v63 = vld [vmem:[#allocation5 + $0x7d8] sm:$0xff]  ;;  %v890_v0 = vld [vmem:[#allocation5 + $0x800] sm:$0xff]  ;;  %v2480_v3 = vpack.c.bf16 %v879_v59, %v874_v58  ;;  %v931_v59 = vld [vmem:[#allocation5 + $0x948] sm:$0xff] }
  0xe3   :  { %448 = vmatmul.mubr.f32.vlgmr.msra.gmra.mrb[2].mxu0 %v3205_v26  ;;  %689 = vmatmul.mubr.f32.vlgmr.msra.gmra.mrb[2].mxu1 %v3205_v26 }
  0xe4   :  { %2397 = vmatpush1.bf16.msra.mxu0 %v2396_v12  ;;  %2444 = vmatpush1.bf16.msra.mxu1 %v2443_v13  ;;  %v587_v12 = vld [vmem:[#allocation5 + $0x658] sm:$0xff]  ;;  %v592_v13 = vld [vmem:[#allocation5 + $0x680] sm:$0xff] }
  0xe5   :  { %2399 = vmatprep.subr.bf16.mxu0 %v2398_v14  ;;  %2445 = vmatprep.subr.bf16.mxu1 %v3066_v28  ;;  %v2424_v14 = vpack.c.bf16 %v581_v9, %v576_v8  ;;  %v2426_v16 = vpack.c.bf16 %v592_v13, %v587_v12  ;;  %v886_v8 = vld [vmem:[#allocation5 + $0x7e0] sm:$0xff]  ;;  %v2530_v9 = vpack.c.bf16 %v892_v2, %v887_v1  ;;  %v900_v12 = vld [vmem:[#allocation5 + $0x850] sm:$0xff]  ;;  %v897_v13 = vld [vmem:[#allocation5 + $0x838] sm:$0xff] }
  0xe6   :  { %2053 = vmatprep.mubr.msk.f32.mxu0 %vm237_vm0, %v3199_v47  ;;  %2054 = vmatprep.mubr.msk.f32.mxu1 %vm237_vm0, %v3199_v47 }
  0xe8   :  { %2401 = vmatpush1.bf16.msra.mxu0 %v2400_v21  ;;  %2447 = vmatpush1.bf16.msra.mxu1 %v2446_v22  ;;  %v597_v21 = vld [vmem:[#allocation5 + $0x6a8] sm:$0xff]  ;;  %v602_v22 = vld [vmem:[#allocation5 + $0x6d0] sm:$0xff] }
  0xe9   :  { %2403 = vmatprep.subr.bf16.mxu0 %v2402_v23  ;;  %2448 = vmatprep.subr.bf16.mxu1 %v3066_v28  ;;  %v2428_v23 = vpack.c.bf16 %v591_v18, %v586_v17  ;;  %v2430_v25 = vpack.c.bf16 %v602_v22, %v597_v21  ;;  %v2486_v17 = vpack.c.bf16 %v900_v12, %v895_v11  ;;  %v894_v18 = vld [vmem:[#allocation5 + $0x820] sm:$0xff]  ;;  %v901_v22 = vld [vmem:[#allocation5 + $0x858] sm:$0xff]  ;;  %v952_v11 = vld [vmem:[#allocation5 + $0x9f0] sm:$0xff] }
  0xec   :  { %2405 = vmatpush1.bf16.msra.mxu0 %v2404_v32  ;;  %2450 = vmatpush1.bf16.msra.mxu1 %v2449_v33  ;;  %v607_v32 = vld [vmem:[#allocation5 + $0x6f8] sm:$0xff]  ;;  %v612_v33 = vld [vmem:[#allocation5 + $0x720] sm:$0xff] }
  0xed   :  { %2407 = vmatprep.subr.bf16.mxu0 %v2406_v34  ;;  %2451 = vmatprep.subr.bf16.mxu1 %v3066_v28  ;;  %v2432_v34 = vpack.c.bf16 %v601_v29, %v596_v27  ;;  %v2434_v36 = vpack.c.bf16 %v612_v33, %v607_v32  ;;  %v912_v27 = vld [vmem:[#allocation5 + $0x8b0] sm:$0xff]  ;;  %v2536_v29 = vpack.c.bf16 %v901_v22, %v896_v20  ;;  %v909_v32 = vld [vmem:[#allocation5 + $0x898] sm:$0xff]  ;;  %v906_v33 = vld [vmem:[#allocation5 + $0x880] sm:$0xff] }
  0xee   :  { %v2492_v40 = vpack.c.bf16 %v909_v32, %v904_v31  ;;  %v955_v20 = vld [vmem:[#allocation5 + $0xa08] sm:$0xff]  ;;  %v957_v22 = vld [vmem:[#allocation5 + $0xa18] sm:$0xff] }
  0xef   :  { %v961_v32 = vld [vmem:[#allocation5 + $0xa38] sm:$0xff] }
  0xf0   :  { %2409 = vmatpush1.bf16.msra.mxu0 %v2408_v41  ;;  %2453 = vmatpush1.bf16.msra.mxu1 %v2452_v42  ;;  %v617_v41 = vld [vmem:[#allocation5 + $0x748] sm:$0xff]  ;;  %v622_v42 = vld [vmem:[#allocation5 + $0x770] sm:$0xff] }
  0xf1   :  { %2411 = vmatprep.subr.bf16.mxu0 %v2410_v43  ;;  %2454 = vmatprep.subr.bf16.mxu1 %v3066_v28  ;;  %v2436_v43 = vpack.c.bf16 %v611_v38, %v606_v37  ;;  %v2438_v45 = vpack.c.bf16 %v622_v42, %v617_v41  ;;  %v920_v37 = vld [vmem:[#allocation5 + $0x8f0] sm:$0xff]  ;;  %v917_v38 = vld [vmem:[#allocation5 + $0x8d8] sm:$0xff]  ;;  %v914_v42 = vld [vmem:[#allocation5 + $0x8c0] sm:$0xff] }
  0xf4   :  { %2413 = vmatpush1.bf16.msra.mxu0 %v2412_v51  ;;  %2456 = vmatpush1.bf16.msra.mxu1 %v2455_v52  ;;  %v875_v51 = vld [vmem:[#allocation5 + $0x788] sm:$0xff]  ;;  %v880_v52 = vld [vmem:[#allocation5 + $0x7b0] sm:$0xff] }
  0xf5   :  { %2415 = vmatprep.subr.bf16.mxu0 %v2414_v53  ;;  %2457 = vmatprep.subr.bf16.mxu1 %v3066_v28  ;;  %v877_v53 = vld [vmem:[#allocation5 + $0x798] sm:$0xff]  ;;  %v2478_v57 = vpack.c.bf16 %v880_v52, %v875_v51  ;;  %v932_v51 = vld [vmem:[#allocation5 + $0x950] sm:$0xff] }
  0xf6   :  { %v2546_v58 = vpack.c.bf16 %v932_v51, %v927_v50 }
  0xf8   :  { %2417 = vmatpush1.bf16.msra.mxu0 %v2416_v60  ;;  %2459 = vmatpush1.bf16.msra.mxu1 %v2458_v61  ;;  %v876_v60 = vld [vmem:[#allocation5 + $0x790] sm:$0xff]  ;;  %v2526_v61 = vpack.c.bf16 %v882_v54, %v877_v53  ;;  %v2498_v54 = vpack.c.bf16 %v930_v49, %v925_v48  ;;  %v982_v48 = vld [vmem:[#allocation5 + $0xae0] sm:$0xff] }
  0xf9   :  { %2419 = vmatprep.subr.bf16.mxu0 %v2418_v62  ;;  %2460 = vmatprep.subr.bf16.mxu1 %v3066_v28  ;;  %v881_v62 = vld [vmem:[#allocation5 + $0x7b8] sm:$0xff] }
  0xfa   :  { %v2528_v4 = vpack.c.bf16 %v881_v62, %v876_v60  ;;  %v935_v60 = vld [vmem:[#allocation5 + $0x968] sm:$0xff]  ;;  %v937_v62 = vld [vmem:[#allocation5 + $0x978] sm:$0xff] }
  0xfc   :  { %2421 = vmatpush1.bf16.msra.mxu0 %v2420_v5  ;;  %2462 = vmatpush1.bf16.msra.mxu1 %v2461_v6  ;;  %v2482_v5 = vpack.c.bf16 %v890_v0, %v885_v63  ;;  %v884_v6 = vld [vmem:[#allocation5 + $0x7d0] sm:$0xff]  ;;  %v942_v63 = vld [vmem:[#allocation5 + $0x9a0] sm:$0xff] }
  0xfd   :  { %2423 = vmatprep.subr.bf16.mxu0 %v2422_v7  ;;  %2463 = vmatprep.subr.bf16.mxu1 %v3066_v28  ;;  %v889_v7 = vld [vmem:[#allocation5 + $0x7f8] sm:$0xff] }
 0x100   :  { %2425 = vmatpush1.bf16.msra.mxu0 %v2424_v14  ;;  %2465 = vmatpush1.bf16.msra.mxu1 %v2464_v15  ;;  %v902_v14 = vld [vmem:[#allocation5 + $0x860] sm:$0xff]  ;;  %v2484_v15 = vpack.c.bf16 %v889_v7, %v884_v6  ;;  %v2550_v6 = vpack.c.bf16 %v942_v63, %v937_v62  ;;  %v941_v7 = vld [vmem:[#allocation5 + $0x998] sm:$0xff] }
 0x101   :  { %2427 = vmatprep.subr.bf16.mxu0 %v2426_v16  ;;  %2466 = vmatprep.subr.bf16.mxu1 %v3066_v28  ;;  %v2532_v16 = vpack.c.bf16 %v891_v10, %v886_v8  ;;  %v2534_v21 = vpack.c.bf16 %v902_v14, %v897_v13  ;;  %v945_v8 = vld [vmem:[#allocation5 + $0x9b8] sm:$0xff]  ;;  %v947_v10 = vld [vmem:[#allocation5 + $0x9c8] sm:$0xff] }
 0x104   :  { %2429 = vmatpush1.bf16.msra.mxu0 %v2428_v23  ;;  %2468 = vmatpush1.bf16.msra.mxu1 %v2467_v24  ;;  %v905_v23 = vld [vmem:[#allocation5 + $0x878] sm:$0xff]  ;;  %v910_v24 = vld [vmem:[#allocation5 + $0x8a0] sm:$0xff] }
 0x105   :  { %2431 = vmatprep.subr.bf16.mxu0 %v2430_v25  ;;  %2469 = vmatprep.subr.bf16.mxu1 %v3066_v28  ;;  %v907_v25 = vld [vmem:[#allocation5 + $0x888] sm:$0xff]  ;;  %v2490_v30 = vpack.c.bf16 %v910_v24, %v905_v23  ;;  %v962_v23 = vld [vmem:[#allocation5 + $0xa40] sm:$0xff] }
 0x106   :  { %v2558_v31 = vpack.c.bf16 %v962_v23, %v957_v22  ;;  %v1259_v22 = vld [vmem:[#allocation5 + $0xbb8] sm:$0xff]  ;;  %v3250_v23 = vld [vmem:[#allocation2] sm:$0xff] }
 0x108   :  { %2433 = vmatpush1.bf16.msra.mxu0 %v2432_v34  ;;  %2471 = vmatpush1.bf16.msra.mxu1 %v2470_v35  ;;  %v2538_v34 = vpack.c.bf16 %v912_v27, %v907_v25  ;;  %v911_v35 = vld [vmem:[#allocation5 + $0x8a8] sm:$0xff] }
 0x109   :  { %2435 = vmatprep.subr.bf16.mxu0 %v2434_v36  ;;  %2472 = vmatprep.subr.bf16.mxu1 %v3066_v28  ;;  %v915_v36 = vld [vmem:[#allocation5 + $0x8c8] sm:$0xff] }
 0x10a   :  { %v2494_v41 = vpack.c.bf16 %v920_v37, %v915_v36  ;;  %v972_v36 = vld [vmem:[#allocation5 + $0xa90] sm:$0xff] }
 0x10c   :  { %2437 = vmatpush1.bf16.msra.mxu0 %v2436_v43  ;;  %2474 = vmatpush1.bf16.msra.mxu1 %v2473_v44  ;;  %v919_v43 = vld [vmem:[#allocation5 + $0x8e8] sm:$0xff]  ;;  %v916_v44 = vld [vmem:[#allocation5 + $0x8d0] sm:$0xff] }
 0x10d   :  { %2439 = vmatprep.subr.bf16.mxu0 %v2438_v45  ;;  %2475 = vmatprep.subr.bf16.mxu1 %v3066_v28  ;;  %v2542_v45 = vpack.c.bf16 %v922_v39, %v917_v38  ;;  %v2496_v52 = vpack.c.bf16 %v919_v43, %v914_v42  ;;  %v2544_v53 = vpack.c.bf16 %v921_v46, %v916_v44  ;;  %v971_v43 = vld [vmem:[#allocation5 + $0xa88] sm:$0xff]  ;;  %v977_v46 = vld [vmem:[#allocation5 + $0xab8] sm:$0xff] }
 0x10e   :  { %v975_v44 = vld [vmem:[#allocation5 + $0xaa8] sm:$0xff] }
 0x110   :  { %2441 = vmatpush1.bf16.msra.mxu0 %v2440_v55  ;;  %2477 = vmatpush1.bf16.msra.mxu1 %v2476_v56  ;;  %v924_v55 = vld [vmem:[#allocation5 + $0x910] sm:$0xff]  ;;  %v929_v56 = vld [vmem:[#allocation5 + $0x938] sm:$0xff] }
 0x111   :  { %2479 = vmatprep.subr.bf16.mxu0 %v2478_v57  ;;  %2527 = vmatprep.subr.bf16.mxu1 %v2526_v61  ;;  %v926_v57 = vld [vmem:[#allocation5 + $0x920] sm:$0xff]  ;;  %v940_v61 = vld [vmem:[#allocation5 + $0x990] sm:$0xff]  ;;  %v2500_v0 = vpack.c.bf16 %v929_v56, %v924_v55  ;;  %v2566_v55 = vpack.c.bf16 %v982_v48, %v977_v46  ;;  %v981_v56 = vld [vmem:[#allocation5 + $0xad8] sm:$0xff] }
 0x112   :  { %v2548_v1 = vpack.c.bf16 %v931_v59, %v926_v57  ;;  %v2502_v2 = vpack.c.bf16 %v940_v61, %v935_v60  ;;  %v985_v57 = vld [vmem:[#allocation5 + $0xaf8] sm:$0xff]  ;;  %v987_v59 = vld [vmem:[#allocation5 + $0xb08] sm:$0xff]  ;;  %v992_v60 = vld [vmem:[#allocation5 + $0xb30] sm:$0xff] }
 0x113   :  { %760 = vmatmul.mubr.f32.vlgmr.msra.gmra.mrb[4].mxu0 %v3205_v26  ;;  %831 = vmatmul.mubr.f32.vlgmr.msra.gmra.mrb[4].mxu1 %v3205_v26  ;;  %v2488_v26 = vpack.c.bf16 %v899_v19, %v894_v18  ;;  %v2554_v18 = vpack.c.bf16 %v952_v11, %v947_v10  ;;  %v951_v19 = vld [vmem:[#allocation5 + $0x9e8] sm:$0xff]  ;;  %v918_v48 = vld [vmem:[#allocation5 + $0x8e0] sm:$0xff] }
 0x114   :  { %2481 = vmatpush1.bf16.msra.mxu0 %v2480_v3  ;;  %2529 = vmatpush1.bf16.msra.mxu1 %v2528_v4  ;;  %v934_v3 = vld [vmem:[#allocation5 + $0x960] sm:$0xff]  ;;  %v939_v4 = vld [vmem:[#allocation5 + $0x988] sm:$0xff] }
 0x115   :  { %2483 = vmatprep.subr.bf16.mxu0 %v2482_v5  ;;  %2531 = vmatprep.subr.bf16.mxu1 %v2530_v9  ;;  %v936_v5 = vld [vmem:[#allocation5 + $0x970] sm:$0xff]  ;;  %v950_v9 = vld [vmem:[#allocation5 + $0x9e0] sm:$0xff]  ;;  %v2504_v12 = vpack.c.bf16 %v939_v4, %v934_v3  ;;  %v991_v4 = vld [vmem:[#allocation5 + $0xb28] sm:$0xff] }
 0x116   :  { %2055 = vmatprep.mubr.msk.f32.mxu0 %vm237_vm0, %v3199_v47  ;;  %2056 = vmatprep.mubr.msk.f32.mxu1 %vm237_vm0, %v3199_v47  ;;  %v2540_v47 = vpack.c.bf16 %v911_v35, %v906_v33  ;;  %v2552_v13 = vpack.c.bf16 %v941_v7, %v936_v5  ;;  %v2506_v14 = vpack.c.bf16 %v950_v9, %v945_v8  ;;  %v965_v33 = vld [vmem:[#allocation5 + $0xa58] sm:$0xff]  ;;  %v967_v35 = vld [vmem:[#allocation5 + $0xa68] sm:$0xff]  ;;  %v986_v3 = vld [vmem:[#allocation5 + $0xb00] sm:$0xff] }
 0x117   :  { %v2562_v42 = vpack.c.bf16 %v972_v36, %v967_v35  ;;  %v1245_v5 = vld [vmem:[#allocation5 + $0xb48] sm:$0xff]  ;;  %v2572_v8 = vpack.c.bf16 %v991_v4, %v986_v3  ;;  %v878_v9 = vld [vmem:[#allocation5 + $0x7a0] sm:$0xff]  ;;  %v1275_v35 = vld [vmem:[#allocation5 + $0xc38] sm:$0xff] }
 0x118   :  { %2485 = vmatpush1.bf16.msra.mxu0 %v2484_v15  ;;  %2533 = vmatpush1.bf16.msra.mxu1 %v2532_v16  ;;  %v944_v15 = vld [vmem:[#allocation5 + $0x9b0] sm:$0xff]  ;;  %v949_v16 = vld [vmem:[#allocation5 + $0x9d8] sm:$0xff]  ;;  %v883_v10 = vld [vmem:[#allocation5 + $0x7c8] sm:$0xff] }
 0x119   :  { %2487 = vmatprep.subr.bf16.mxu0 %v2486_v17  ;;  %2535 = vmatprep.subr.bf16.mxu1 %v2534_v21  ;;  %v946_v17 = vld [vmem:[#allocation5 + $0x9c0] sm:$0xff]  ;;  %v960_v21 = vld [vmem:[#allocation5 + $0xa30] sm:$0xff]  ;;  %v2508_v24 = vpack.c.bf16 %v949_v16, %v944_v15  ;;  %v2575_v16 = vpack.c.bf16 %v883_v10, %v878_v9  ;;  %v943_v3 = vld [vmem:[#allocation5 + $0x9a8] sm:$0xff] }
 0x11a   :  { %v2556_v25 = vpack.c.bf16 %v951_v19, %v946_v17  ;;  %v2510_v27 = vpack.c.bf16 %v960_v21, %v955_v20  ;;  %v1260_v15 = vld [vmem:[#allocation5 + $0xbc0] sm:$0xff]  ;;  %v893_v19 = vld [vmem:[#allocation5 + $0x818] sm:$0xff]  ;;  %v1254_v21 = vld [vmem:[#allocation5 + $0xb90] sm:$0xff] }
 0x11b   :  { %v1280_v36 = vld [vmem:[#allocation5 + $0xc60] sm:$0xff] }
 0x11c   :  { %2489 = vmatpush1.bf16.msra.mxu0 %v2488_v26  ;;  %2537 = vmatpush1.bf16.msra.mxu1 %v2536_v29  ;;  %v954_v26 = vld [vmem:[#allocation5 + $0xa00] sm:$0xff]  ;;  %v959_v29 = vld [vmem:[#allocation5 + $0xa28] sm:$0xff] }
 0x11d   :  { %2491 = vmatprep.subr.bf16.mxu0 %v2490_v30  ;;  %2539 = vmatprep.subr.bf16.mxu1 %v2538_v34  ;;  %v956_v30 = vld [vmem:[#allocation5 + $0xa10] sm:$0xff]  ;;  %v970_v34 = vld [vmem:[#allocation5 + $0xa80] sm:$0xff]  ;;  %v2512_v37 = vpack.c.bf16 %v959_v29, %v954_v26  ;;  %v2616_v26 = vpack.c.bf16 %v1259_v22, %v1254_v21  ;;  %v963_v21 = vld [vmem:[#allocation5 + $0xa48] sm:$0xff] }
 0x11e   :  { %v2560_v38 = vpack.c.bf16 %v961_v32, %v956_v30  ;;  %v2514_v39 = vpack.c.bf16 %v970_v34, %v965_v33  ;;  %v898_v29 = vld [vmem:[#allocation5 + $0x840] sm:$0xff]  ;;  %v903_v30 = vld [vmem:[#allocation5 + $0x868] sm:$0xff]  ;;  %v3255_v34 = vld [vmem:[#allocation2 + $0x8] sm:$0xff] }
 0x11f   :  { %v1264_v32 = vld [vmem:[#allocation5 + $0xbe0] sm:$0xff]  ;;  %v1269_v33 = vld [vmem:[#allocation5 + $0xc08] sm:$0xff] }
 0x120   :  { %2493 = vmatpush1.bf16.msra.mxu0 %v2492_v40  ;;  %2541 = vmatpush1.bf16.msra.mxu1 %v2540_v47  ;;  %v964_v40 = vld [vmem:[#allocation5 + $0xa50] sm:$0xff]  ;;  %v969_v47 = vld [vmem:[#allocation5 + $0xa78] sm:$0xff] }
 0x121   :  { %2495 = vmatprep.subr.bf16.mxu0 %v2494_v41  ;;  %2543 = vmatprep.subr.bf16.mxu1 %v2542_v45  ;;  %v966_v41 = vld [vmem:[#allocation5 + $0xa60] sm:$0xff]  ;;  %v980_v45 = vld [vmem:[#allocation5 + $0xad0] sm:$0xff]  ;;  %v2516_v49 = vpack.c.bf16 %v969_v47, %v964_v40  ;;  %v913_v40 = vld [vmem:[#allocation5 + $0x8b8] sm:$0xff]  ;;  %v2622_v47 = vpack.c.bf16 %v1280_v36, %v1275_v35 }
 0x122   :  { %v2564_v50 = vpack.c.bf16 %v971_v43, %v966_v41  ;;  %v2518_v51 = vpack.c.bf16 %v980_v45, %v975_v44  ;;  %v1274_v41 = vld [vmem:[#allocation5 + $0xc30] sm:$0xff]  ;;  %v1285_v43 = vld [vmem:[#allocation5 + $0xc88] sm:$0xff]  ;;  %v1339_v36 = vld [vmem:[#allocation5 + $0xe38] sm:$0xff] }
 0x123   :  { %v1290_v44 = vld [vmem:[#allocation5 + $0xcb0] sm:$0xff] }
 0x124   :  { %2497 = vmatpush1.bf16.msra.mxu0 %v2496_v52  ;;  %2545 = vmatpush1.bf16.msra.mxu1 %v2544_v53  ;;  %v974_v52 = vld [vmem:[#allocation5 + $0xaa0] sm:$0xff]  ;;  %v979_v53 = vld [vmem:[#allocation5 + $0xac8] sm:$0xff]  ;;  %v1334_v35 = vld [vmem:[#allocation5 + $0xe10] sm:$0xff] }
 0x125   :  { %2499 = vmatprep.subr.bf16.mxu0 %v2498_v54  ;;  %2547 = vmatprep.subr.bf16.mxu1 %v2546_v58  ;;  %v976_v54 = vld [vmem:[#allocation5 + $0xab0] sm:$0xff]  ;;  %v990_v58 = vld [vmem:[#allocation5 + $0xb20] sm:$0xff]  ;;  %v2520_v61 = vpack.c.bf16 %v979_v53, %v974_v52  ;;  %v1289_v52 = vld [vmem:[#allocation5 + $0xca8] sm:$0xff] }
 0x126   :  { %v2568_v62 = vpack.c.bf16 %v981_v56, %v976_v54  ;;  %v2522_v63 = vpack.c.bf16 %v990_v58, %v985_v57  ;;  %v1295_v53 = vld [vmem:[#allocation5 + $0xcd8] sm:$0xff]  ;;  %v1300_v54 = vld [vmem:[#allocation5 + $0xd00] sm:$0xff]  ;;  %v928_v57 = vld [vmem:[#allocation5 + $0x930] sm:$0xff] }
 0x127   :  { %v933_v58 = vld [vmem:[#allocation5 + $0x958] sm:$0xff] }
 0x128   :  { %2501 = vmatpush1.bf16.msra.mxu0 %v2500_v0  ;;  %2549 = vmatpush1.bf16.msra.mxu1 %v2548_v1  ;;  %v984_v0 = vld [vmem:[#allocation5 + $0xaf0] sm:$0xff]  ;;  %v989_v1 = vld [vmem:[#allocation5 + $0xb18] sm:$0xff] }
 0x129   :  { %2503 = vmatprep.subr.bf16.mxu0 %v2502_v2  ;;  %2551 = vmatprep.subr.bf16.mxu1 %v2550_v6  ;;  %v2570_v2 = vpack.c.bf16 %v992_v60, %v987_v59  ;;  %v1250_v6 = vld [vmem:[#allocation5 + $0xb70] sm:$0xff]  ;;  %v2524_v7 = vpack.c.bf16 %v989_v1, %v984_v0  ;;  %v2630_v59 = vpack.c.bf16 %v1300_v54, %v1295_v53  ;;  %v1359_v54 = vld [vmem:[#allocation5 + $0xed8] sm:$0xff] }
 0x12a   :  { %v2610_v11 = vpack.c.bf16 %v1250_v6, %v1245_v5  ;;  %v1294_v60 = vld [vmem:[#allocation5 + $0xcd0] sm:$0xff]  ;;  %v2590_v0 = vpack.c.bf16 %v933_v58, %v928_v57  ;;  %v1304_v5 = vld [vmem:[#allocation5 + $0xd20] sm:$0xff]  ;;  %v1309_v6 = vld [vmem:[#allocation5 + $0xd48] sm:$0xff] }
 0x12b   :  { %v2636_v10 = vpack.c.bf16 %v1309_v6, %v1304_v5  ;;  %v1256_v5 = vld [vmem:[#allocation5 + $0xba0] sm:$0xff]  ;;  %v1261_v6 = vld [vmem:[#allocation5 + $0xbc8] sm:$0xff] }
 0x12c   :  { %2505 = vmatpush1.bf16.msra.mxu0 %v2504_v12  ;;  %2553 = vmatpush1.bf16.msra.mxu1 %v2552_v13  ;;  %v1244_v12 = vld [vmem:[#allocation5 + $0xb40] sm:$0xff]  ;;  %v1249_v13 = vld [vmem:[#allocation5 + $0xb68] sm:$0xff] }
 0x12d   :  { %2507 = vmatprep.subr.bf16.mxu0 %v2506_v14  ;;  %2555 = vmatprep.subr.bf16.mxu1 %v2554_v18  ;;  %v1255_v14 = vld [vmem:[#allocation5 + $0xb98] sm:$0xff]  ;;  %v2612_v17 = vpack.c.bf16 %v1249_v13, %v1244_v12  ;;  %v888_v18 = vld [vmem:[#allocation5 + $0x7f0] sm:$0xff] }
 0x12e   :  { %v2614_v20 = vpack.c.bf16 %v1260_v15, %v1255_v14  ;;  %v953_v12 = vld [vmem:[#allocation5 + $0x9f8] sm:$0xff]  ;;  %v1314_v14 = vld [vmem:[#allocation5 + $0xd70] sm:$0xff] }
 0x12f   :  { %v1319_v15 = vld [vmem:[#allocation5 + $0xd98] sm:$0xff] }
 0x130   :  { %2509 = vmatpush1.bf16.msra.mxu0 %v2508_v24  ;;  %2557 = vmatpush1.bf16.msra.mxu1 %v2556_v25  ;;  %v1265_v24 = vld [vmem:[#allocation5 + $0xbe8] sm:$0xff]  ;;  %v1270_v25 = vld [vmem:[#allocation5 + $0xc10] sm:$0xff] }
 0x131   :  { %2511 = vmatprep.subr.bf16.mxu0 %v2510_v27  ;;  %2559 = vmatprep.subr.bf16.mxu1 %v2558_v31  ;;  %v2578_v27 = vpack.c.bf16 %v893_v19, %v888_v18  ;;  %v2618_v31 = vpack.c.bf16 %v1270_v25, %v1265_v24  ;;  %v2640_v19 = vpack.c.bf16 %v1319_v15, %v1314_v14  ;;  %v1324_v24 = vld [vmem:[#allocation5 + $0xdc0] sm:$0xff]  ;;  %v1329_v25 = vld [vmem:[#allocation5 + $0xde8] sm:$0xff]  ;;  %v1266_v14 = vld [vmem:[#allocation5 + $0xbf0] sm:$0xff] }
 0x132   :  { %v1271_v15 = vld [vmem:[#allocation5 + $0xc18] sm:$0xff] }
 0x134   :  { %2513 = vmatpush1.bf16.msra.mxu0 %v2512_v37  ;;  %2561 = vmatpush1.bf16.msra.mxu1 %v2560_v38  ;;  %v2581_v37 = vpack.c.bf16 %v903_v30, %v898_v29  ;;  %v2620_v38 = vpack.c.bf16 %v1269_v33, %v1264_v32  ;;  %v2644_v30 = vpack.c.bf16 %v1329_v25, %v1324_v24  ;;  %v973_v32 = vld [vmem:[#allocation5 + $0xa98] sm:$0xff]  ;;  %v1276_v24 = vld [vmem:[#allocation5 + $0xc40] sm:$0xff]  ;;  %v1281_v25 = vld [vmem:[#allocation5 + $0xc68] sm:$0xff] }
 0x135   :  { %2515 = vmatprep.subr.bf16.mxu0 %v2514_v39  ;;  %2563 = vmatprep.subr.bf16.mxu1 %v2562_v42  ;;  %v908_v39 = vld [vmem:[#allocation5 + $0x890] sm:$0xff]  ;;  %v1279_v42 = vld [vmem:[#allocation5 + $0xc58] sm:$0xff] }
 0x136   :  { %v2584_v45 = vpack.c.bf16 %v913_v40, %v908_v39  ;;  %v2624_v46 = vpack.c.bf16 %v1279_v42, %v1274_v41  ;;  %v2648_v40 = vpack.c.bf16 %v1339_v36, %v1334_v35  ;;  %v983_v41 = vld [vmem:[#allocation5 + $0xae8] sm:$0xff]  ;;  %v1291_v35 = vld [vmem:[#allocation5 + $0xcb8] sm:$0xff]  ;;  %v1288_v36 = vld [vmem:[#allocation5 + $0xca0] sm:$0xff] }
 0x138   :  { %2517 = vmatpush1.bf16.msra.mxu0 %v2516_v49  ;;  %2565 = vmatpush1.bf16.msra.mxu1 %v2564_v50  ;;  %v923_v49 = vld [vmem:[#allocation5 + $0x908] sm:$0xff]  ;;  %v2626_v50 = vpack.c.bf16 %v1290_v44, %v1285_v43  ;;  %v1344_v43 = vld [vmem:[#allocation5 + $0xe60] sm:$0xff] }
 0x139   :  { %2519 = vmatprep.subr.bf16.mxu0 %v2518_v51  ;;  %2567 = vmatprep.subr.bf16.mxu1 %v2566_v55  ;;  %v1284_v51 = vld [vmem:[#allocation5 + $0xc80] sm:$0xff]  ;;  %v2587_v55 = vpack.c.bf16 %v923_v49, %v918_v48  ;;  %v1349_v44 = vld [vmem:[#allocation5 + $0xe88] sm:$0xff] }
 0x13a   :  { %v2628_v56 = vpack.c.bf16 %v1289_v52, %v1284_v51  ;;  %v2652_v49 = vpack.c.bf16 %v1349_v44, %v1344_v43  ;;  %v993_v51 = vld [vmem:[#allocation5 + $0xb38] sm:$0xff]  ;;  %v1354_v52 = vld [vmem:[#allocation5 + $0xeb0] sm:$0xff]  ;;  %v1301_v43 = vld [vmem:[#allocation5 + $0xd08] sm:$0xff] }
 0x13b   :  { %v2656_v58 = vpack.c.bf16 %v1359_v54, %v1354_v52  ;;  %v1298_v44 = vld [vmem:[#allocation5 + $0xcf0] sm:$0xff]  ;;  %v1308_v54 = vld [vmem:[#allocation5 + $0xd40] sm:$0xff] }
 0x13c   :  { %2521 = vmatpush1.bf16.msra.mxu0 %v2520_v61  ;;  %2569 = vmatpush1.bf16.msra.mxu1 %v2568_v62  ;;  %v1299_v61 = vld [vmem:[#allocation5 + $0xcf8] sm:$0xff]  ;;  %v1305_v62 = vld [vmem:[#allocation5 + $0xd28] sm:$0xff]  ;;  %v1306_v52 = vld [vmem:[#allocation5 + $0xd30] sm:$0xff] }
 0x13d   :  { %2523 = vmatprep.subr.bf16.mxu0 %v2522_v63  ;;  %2571 = vmatprep.subr.bf16.mxu1 %v2570_v2  ;;  %v1310_v63 = vld [vmem:[#allocation5 + $0xd50] sm:$0xff]  ;;  %v2632_v1 = vpack.c.bf16 %v1299_v61, %v1294_v60  ;;  %v938_v2 = vld [vmem:[#allocation5 + $0x980] sm:$0xff]  ;;  %v1251_v61 = vld [vmem:[#allocation5 + $0xb78] sm:$0xff] }
 0x13e   :  { %v2634_v4 = vpack.c.bf16 %v1310_v63, %v1305_v62  ;;  %v2593_v9 = vpack.c.bf16 %v943_v3, %v938_v2  ;;  %v1246_v60 = vld [vmem:[#allocation5 + $0xb50] sm:$0xff]  ;;  %v1248_v62 = vld [vmem:[#allocation5 + $0xb60] sm:$0xff]  ;;  %v1253_v63 = vld [vmem:[#allocation5 + $0xb88] sm:$0xff] }
 0x13f   :  { %v2660_v2 = vpack.c.bf16 %v1251_v61, %v1246_v60  ;;  %v2707_v3 = vpack.c.bf16 %v1253_v63, %v1248_v62 }
 0x140   :  { %2525 = vmatpush1.bf16.msra.mxu0 %v2524_v7  ;;  %2573 = vmatpush1.bf16.msra.mxu1 %v2572_v8  ;;  %v1315_v7 = vld [vmem:[#allocation5 + $0xd78] sm:$0xff]  ;;  %v1320_v8 = vld [vmem:[#allocation5 + $0xda0] sm:$0xff] }
 0x141   :  { %2574 = vmatprep.subr.bf16.mxu0 %v3066_v28  ;;  %2611 = vmatprep.subr.bf16.mxu1 %v2610_v11  ;;  %v948_v11 = vld [vmem:[#allocation5 + $0x9d0] sm:$0xff]  ;;  %v2638_v13 = vpack.c.bf16 %v1320_v8, %v1315_v7  ;;  %v1263_v8 = vld [vmem:[#allocation5 + $0xbd8] sm:$0xff] }
 0x142   :  { %v2596_v18 = vpack.c.bf16 %v953_v12, %v948_v11  ;;  %v1258_v7 = vld [vmem:[#allocation5 + $0xbb0] sm:$0xff]  ;;  %v2664_v11 = vpack.c.bf16 %v1261_v6, %v1256_v5  ;;  %v1327_v5 = vld [vmem:[#allocation5 + $0xdd8] sm:$0xff]  ;;  %v1332_v6 = vld [vmem:[#allocation5 + $0xe00] sm:$0xff] }
 0x143   :  { %1059 = vmatmul.mubr.f32.vlgmr.msra.gmra.mrb[6].mxu0 %v3250_v23  ;;  %1130 = vmatmul.mubr.f32.vlgmr.msra.gmra.mrb[6].mxu1 %v3250_v23  ;;  %v2710_v12 = vpack.c.bf16 %v1263_v8, %v1258_v7 }
 0x144   :  { %2576 = vmatpush1.bf16.msra.mxu0 %v2575_v16  ;;  %2613 = vmatpush1.bf16.msra.mxu1 %v2612_v17  ;;  %v1325_v16 = vld [vmem:[#allocation5 + $0xdc8] sm:$0xff]  ;;  %v1330_v17 = vld [vmem:[#allocation5 + $0xdf0] sm:$0xff] }
 0x145   :  { %2577 = vmatprep.subr.bf16.mxu0 %v3066_v28  ;;  %2615 = vmatprep.subr.bf16.mxu1 %v2614_v20  ;;  %v958_v20 = vld [vmem:[#allocation5 + $0xa20] sm:$0xff]  ;;  %v2642_v22 = vpack.c.bf16 %v1330_v17, %v1325_v16  ;;  %v1273_v17 = vld [vmem:[#allocation5 + $0xc28] sm:$0xff] }
 0x146   :  { %2057 = vmatprep.mubr.msk.f32.mxu0 %vm237_vm0, %v3255_v34  ;;  %2058 = vmatprep.mubr.msk.f32.mxu1 %vm237_vm0, %v3255_v34  ;;  %v2599_v29 = vpack.c.bf16 %v963_v21, %v958_v20  ;;  %v1268_v16 = vld [vmem:[#allocation5 + $0xc00] sm:$0xff]  ;;  %v2668_v20 = vpack.c.bf16 %v1271_v15, %v1266_v14  ;;  %v1337_v14 = vld [vmem:[#allocation5 + $0xe28] sm:$0xff]  ;;  %v1342_v15 = vld [vmem:[#allocation5 + $0xe50] sm:$0xff] }
 0x147   :  { %v2713_v21 = vpack.c.bf16 %v1273_v17, %v1268_v16 }
 0x148   :  { %2579 = vmatpush1.bf16.msra.mxu0 %v2578_v27  ;;  %2617 = vmatpush1.bf16.msra.mxu1 %v2616_v26  ;;  %v1335_v27 = vld [vmem:[#allocation5 + $0xe18] sm:$0xff]  ;;  %v1340_v26 = vld [vmem:[#allocation5 + $0xe40] sm:$0xff] }
 0x149   :  { %2580 = vmatprep.subr.bf16.mxu0 %v3066_v28  ;;  %2619 = vmatprep.subr.bf16.mxu1 %v2618_v31  ;;  %v968_v31 = vld [vmem:[#allocation5 + $0xa70] sm:$0xff]  ;;  %v2646_v33 = vpack.c.bf16 %v1340_v26, %v1335_v27  ;;  %v1283_v26 = vld [vmem:[#allocation5 + $0xc78] sm:$0xff] }
 0x14a   :  { %v2602_v39 = vpack.c.bf16 %v973_v32, %v968_v31  ;;  %v1278_v27 = vld [vmem:[#allocation5 + $0xc50] sm:$0xff]  ;;  %v2672_v31 = vpack.c.bf16 %v1281_v25, %v1276_v24  ;;  %v1347_v24 = vld [vmem:[#allocation5 + $0xe78] sm:$0xff]  ;;  %v1352_v25 = vld [vmem:[#allocation5 + $0xea0] sm:$0xff] }
 0x14b   :  { %v2716_v32 = vpack.c.bf16 %v1283_v26, %v1278_v27 }
 0x14c   :  { %2582 = vmatpush1.bf16.msra.mxu0 %v2581_v37  ;;  %2621 = vmatpush1.bf16.msra.mxu1 %v2620_v38  ;;  %v1345_v37 = vld [vmem:[#allocation5 + $0xe68] sm:$0xff]  ;;  %v1350_v38 = vld [vmem:[#allocation5 + $0xe90] sm:$0xff] }
 0x14d   :  { %2583 = vmatprep.subr.bf16.mxu0 %v3066_v28  ;;  %2623 = vmatprep.subr.bf16.mxu1 %v2622_v47  ;;  %v978_v47 = vld [vmem:[#allocation5 + $0xac0] sm:$0xff]  ;;  %v2650_v42 = vpack.c.bf16 %v1350_v38, %v1345_v37  ;;  %v1293_v37 = vld [vmem:[#allocation5 + $0xcc8] sm:$0xff] }
 0x14e   :  { %v2605_v48 = vpack.c.bf16 %v983_v41, %v978_v47  ;;  %v1297_v38 = vld [vmem:[#allocation5 + $0xce8] sm:$0xff]  ;;  %v2719_v47 = vpack.c.bf16 %v1293_v37, %v1288_v36 }
 0x150   :  { %2585 = vmatpush1.bf16.msra.mxu0 %v2584_v45  ;;  %2625 = vmatpush1.bf16.msra.mxu1 %v2624_v46  ;;  %v1355_v45 = vld [vmem:[#allocation5 + $0xeb8] sm:$0xff]  ;;  %v1360_v46 = vld [vmem:[#allocation5 + $0xee0] sm:$0xff] }
 0x151   :  { %2586 = vmatprep.subr.bf16.mxu0 %v3066_v28  ;;  %2627 = vmatprep.subr.bf16.mxu1 %v2626_v50  ;;  %v988_v50 = vld [vmem:[#allocation5 + $0xb10] sm:$0xff]  ;;  %v2654_v53 = vpack.c.bf16 %v1360_v46, %v1355_v45  ;;  %v1303_v45 = vld [vmem:[#allocation5 + $0xd18] sm:$0xff] }
 0x152   :  { %v2608_v57 = vpack.c.bf16 %v993_v51, %v988_v50  ;;  %v1307_v46 = vld [vmem:[#allocation5 + $0xd38] sm:$0xff]  ;;  %v2722_v50 = vpack.c.bf16 %v1303_v45, %v1298_v44 }
 0x154   :  { %2588 = vmatpush1.bf16.msra.mxu0 %v2587_v55  ;;  %2629 = vmatpush1.bf16.msra.mxu1 %v2628_v56  ;;  %v1247_v55 = vld [vmem:[#allocation5 + $0xb58] sm:$0xff]  ;;  %v1252_v56 = vld [vmem:[#allocation5 + $0xb80] sm:$0xff] }
 0x155   :  { %2589 = vmatprep.subr.bf16.mxu0 %v3066_v28  ;;  %2631 = vmatprep.subr.bf16.mxu1 %v2630_v59  ;;  %v2658_v59 = vpack.c.bf16 %v1252_v56, %v1247_v55  ;;  %v1313_v56 = vld [vmem:[#allocation5 + $0xd68] sm:$0xff] }
 0x156   :  { %v2725_v63 = vpack.c.bf16 %v1313_v56, %v1308_v54 }
 0x158   :  { %2591 = vmatpush1.bf16.msra.mxu0 %v2590_v0  ;;  %2633 = vmatpush1.bf16.msra.mxu1 %v2632_v1  ;;  %v1257_v0 = vld [vmem:[#allocation5 + $0xba8] sm:$0xff]  ;;  %v1262_v1 = vld [vmem:[#allocation5 + $0xbd0] sm:$0xff] }
 0x159   :  { %2592 = vmatprep.subr.bf16.mxu0 %v3066_v28  ;;  %2635 = vmatprep.subr.bf16.mxu1 %v2634_v4  ;;  %v2662_v4 = vpack.c.bf16 %v1262_v1, %v1257_v0  ;;  %v1316_v1 = vld [vmem:[#allocation5 + $0xd80] sm:$0xff] }
 0x15c   :  { %2594 = vmatpush1.bf16.msra.mxu0 %v2593_v9  ;;  %2637 = vmatpush1.bf16.msra.mxu1 %v2636_v10  ;;  %v1267_v9 = vld [vmem:[#allocation5 + $0xbf8] sm:$0xff]  ;;  %v1272_v10 = vld [vmem:[#allocation5 + $0xc20] sm:$0xff] }
 0x15d   :  { %2595 = vmatprep.subr.bf16.mxu0 %v3066_v28  ;;  %2639 = vmatprep.subr.bf16.mxu1 %v2638_v13  ;;  %v2666_v13 = vpack.c.bf16 %v1272_v10, %v1267_v9  ;;  %v2690_v9 = vpack.c.bf16 %v1332_v6, %v1327_v5  ;;  %v1326_v10 = vld [vmem:[#allocation5 + $0xdd0] sm:$0xff] }
 0x160   :  { %2597 = vmatpush1.bf16.msra.mxu0 %v2596_v18  ;;  %2641 = vmatpush1.bf16.msra.mxu1 %v2640_v19  ;;  %v1277_v18 = vld [vmem:[#allocation5 + $0xc48] sm:$0xff]  ;;  %v1282_v19 = vld [vmem:[#allocation5 + $0xc70] sm:$0xff] }
 0x161   :  { %2598 = vmatprep.subr.bf16.mxu0 %v3066_v28  ;;  %2643 = vmatprep.subr.bf16.mxu1 %v2642_v22  ;;  %v2670_v22 = vpack.c.bf16 %v1282_v19, %v1277_v18  ;;  %v2694_v18 = vpack.c.bf16 %v1342_v15, %v1337_v14  ;;  %v1336_v19 = vld [vmem:[#allocation5 + $0xe20] sm:$0xff] }
 0x164   :  { %2600 = vmatpush1.bf16.msra.mxu0 %v2599_v29  ;;  %2645 = vmatpush1.bf16.msra.mxu1 %v2644_v30  ;;  %v1287_v29 = vld [vmem:[#allocation5 + $0xc98] sm:$0xff]  ;;  %v1292_v30 = vld [vmem:[#allocation5 + $0xcc0] sm:$0xff] }
 0x165   :  { %2601 = vmatprep.subr.bf16.mxu0 %v3066_v28  ;;  %2647 = vmatprep.subr.bf16.mxu1 %v2646_v33  ;;  %v1286_v33 = vld [vmem:[#allocation5 + $0xc90] sm:$0xff] }
 0x168   :  { %2603 = vmatpush1.bf16.msra.mxu0 %v2602_v39  ;;  %2649 = vmatpush1.bf16.msra.mxu1 %v2648_v40  ;;  %v1302_v39 = vld [vmem:[#allocation5 + $0xd10] sm:$0xff]  ;;  %v2676_v40 = vpack.c.bf16 %v1291_v35, %v1286_v33  ;;  %v1357_v33 = vld [vmem:[#allocation5 + $0xec8] sm:$0xff] }
 0x169   :  { %2604 = vmatprep.subr.bf16.mxu0 %v3066_v28  ;;  %2651 = vmatprep.subr.bf16.mxu1 %v2650_v42  ;;  %v2678_v41 = vpack.c.bf16 %v1302_v39, %v1297_v38  ;;  %v1296_v42 = vld [vmem:[#allocation5 + $0xce0] sm:$0xff]  ;;  %v1362_v35 = vld [vmem:[#allocation5 + $0xef0] sm:$0xff] }
 0x16a   :  { %v2702_v38 = vpack.c.bf16 %v1362_v35, %v1357_v33  ;;  %v1356_v39 = vld [vmem:[#allocation5 + $0xec0] sm:$0xff]  ;;  %v1667_v33 = vld [vmem:[#allocation8 + $0xb0] sm:$0xff] }
 0x16b   :  { %v1668_v35 = vld [vmem:[#allocation8 + $0xb8] sm:$0xff] }
 0x16c   :  { %2606 = vmatpush1.bf16.msra.mxu0 %v2605_v48  ;;  %2653 = vmatpush1.bf16.msra.mxu1 %v2652_v49  ;;  %v1312_v48 = vld [vmem:[#allocation5 + $0xd60] sm:$0xff]  ;;  %v2680_v49 = vpack.c.bf16 %v1301_v43, %v1296_v42 }
 0x16d   :  { %2607 = vmatprep.subr.bf16.mxu0 %v3066_v28  ;;  %2655 = vmatprep.subr.bf16.mxu1 %v2654_v53  ;;  %v2682_v51 = vpack.c.bf16 %v1312_v48, %v1307_v46  ;;  %v1311_v53 = vld [vmem:[#allocation5 + $0xd58] sm:$0xff] }
 0x16e   :  { %v2684_v62 = vpack.c.bf16 %v1311_v53, %v1306_v52 }
 0x170   :  { %2609 = vmatpush1.bf16.msra.mxu0 %v2608_v57  ;;  %2657 = vmatpush1.bf16.msra.mxu1 %v2656_v58  ;;  %v1317_v57 = vld [vmem:[#allocation5 + $0xd88] sm:$0xff]  ;;  %v1322_v58 = vld [vmem:[#allocation5 + $0xdb0] sm:$0xff] }
 0x171   :  { %2659 = vmatprep.subr.bf16.mxu0 %v2658_v59  ;;  %2706 = vmatprep.subr.bf16.mxu1 %v3066_v28  ;;  %v2686_v0 = vpack.c.bf16 %v1322_v58, %v1317_v57 }
 0x173   :  { %1201 = vmatmul.mubr.f32.vlgmr.msra.gmra.mrb[8].mxu0 %v3250_v23  ;;  %1429 = vmatmul.mubr.f32.vlgmr.msra.gmra.mrb[8].mxu1 %v3250_v23 }
 0x174   :  { %2661 = vmatpush1.bf16.msra.mxu0 %v2660_v2  ;;  %2708 = vmatpush1.bf16.msra.mxu1 %v2707_v3  ;;  %v1321_v2 = vld [vmem:[#allocation5 + $0xda8] sm:$0xff]  ;;  %v1318_v3 = vld [vmem:[#allocation5 + $0xd90] sm:$0xff] }
 0x175   :  { %2663 = vmatprep.subr.bf16.mxu0 %v2662_v4  ;;  %2709 = vmatprep.subr.bf16.mxu1 %v3066_v28  ;;  %v1323_v4 = vld [vmem:[#allocation5 + $0xdb8] sm:$0xff]  ;;  %v2688_v7 = vpack.c.bf16 %v1321_v2, %v1316_v1 }
 0x176   :  { %2059 = vmatprep.mubr.msk.f32.mxu0 %vm237_vm0, %v3255_v34  ;;  %2060 = vmatprep.mubr.msk.f32.mxu1 %vm237_vm0, %v3255_v34  ;;  %v2674_v34 = vpack.c.bf16 %v1292_v30, %v1287_v29  ;;  %v2728_v8 = vpack.c.bf16 %v1323_v4, %v1318_v3  ;;  %v2698_v29 = vpack.c.bf16 %v1352_v25, %v1347_v24  ;;  %v1346_v30 = vld [vmem:[#allocation5 + $0xe70] sm:$0xff]  ;;  %v1648_v25 = vld [vmem:[#allocation8 + $0x18] sm:$0xff] }
 0x177   :  { %v1647_v24 = vld [vmem:[#allocation8 + $0x10] sm:$0xff] }
 0x178   :  { %2665 = vmatpush1.bf16.msra.mxu0 %v2664_v11  ;;  %2711 = vmatpush1.bf16.msra.mxu1 %v2710_v12  ;;  %v1331_v11 = vld [vmem:[#allocation5 + $0xdf8] sm:$0xff]  ;;  %v1328_v12 = vld [vmem:[#allocation5 + $0xde0] sm:$0xff] }
 0x179   :  { %2667 = vmatprep.subr.bf16.mxu0 %v2666_v13  ;;  %2712 = vmatprep.subr.bf16.mxu1 %v3066_v28  ;;  %v1333_v13 = vld [vmem:[#allocation5 + $0xe08] sm:$0xff]  ;;  %v2692_v16 = vpack.c.bf16 %v1331_v11, %v1326_v10 }
 0x17a   :  { %v2731_v17 = vpack.c.bf16 %v1333_v13, %v1328_v12  ;;  %v1661_v11 = vld [vmem:[#allocation8 + $0x80] sm:$0xff]  ;;  %v1662_v12 = vld [vmem:[#allocation8 + $0x88] sm:$0xff] }
 0x17b   :  { %v1645_v13 = vld [vmem:[#allocation8] sm:$0xff] }
 0x17c   :  { %2669 = vmatpush1.bf16.msra.mxu0 %v2668_v20  ;;  %2714 = vmatpush1.bf16.msra.mxu1 %v2713_v21  ;;  %v1341_v20 = vld [vmem:[#allocation5 + $0xe48] sm:$0xff]  ;;  %v1338_v21 = vld [vmem:[#allocation5 + $0xe30] sm:$0xff] }
 0x17d   :  { %2671 = vmatprep.subr.bf16.mxu0 %v2670_v22  ;;  %2715 = vmatprep.subr.bf16.mxu1 %v3066_v28  ;;  %v1343_v22 = vld [vmem:[#allocation5 + $0xe58] sm:$0xff]  ;;  %v2696_v27 = vpack.c.bf16 %v1341_v20, %v1336_v19 }
 0x17e   :  { %v2734_v26 = vpack.c.bf16 %v1343_v22, %v1338_v21  ;;  %v1664_v19 = vld [vmem:[#allocation8 + $0x98] sm:$0xff] }
 0x180   :  { %2673 = vmatpush1.bf16.msra.mxu0 %v2672_v31  ;;  %2717 = vmatpush1.bf16.msra.mxu1 %v2716_v32  ;;  %v1351_v31 = vld [vmem:[#allocation5 + $0xe98] sm:$0xff]  ;;  %v1348_v32 = vld [vmem:[#allocation5 + $0xe80] sm:$0xff] }
 0x181   :  { %2675 = vmatprep.subr.bf16.mxu0 %v2674_v34  ;;  %2718 = vmatprep.subr.bf16.mxu1 %v3066_v28  ;;  %v1353_v34 = vld [vmem:[#allocation5 + $0xea8] sm:$0xff]  ;;  %v2700_v36 = vpack.c.bf16 %v1351_v31, %v1346_v30 }
 0x182   :  { %v2737_v37 = vpack.c.bf16 %v1353_v34, %v1348_v32  ;;  %v1649_v31 = vld [vmem:[#allocation8 + $0x20] sm:$0xff]  ;;  %v1650_v32 = vld [vmem:[#allocation8 + $0x28] sm:$0xff] }
 0x183   :  { %v2752_v34 = vpack.c.bf16 %v1650_v32, %v1649_v31 }
 0x184   :  { %2677 = vmatpush1.bf16.msra.mxu0 %v2676_v40  ;;  %2720 = vmatpush1.bf16.msra.mxu1 %v2719_v47  ;;  %v1361_v40 = vld [vmem:[#allocation5 + $0xee8] sm:$0xff]  ;;  %v1358_v47 = vld [vmem:[#allocation5 + $0xed0] sm:$0xff] }
 0x185   :  { %2679 = vmatprep.subr.bf16.mxu0 %v2678_v41  ;;  %2721 = vmatprep.subr.bf16.mxu1 %v3066_v28  ;;  %v1363_v41 = vld [vmem:[#allocation5 + $0xef8] sm:$0xff]  ;;  %v2704_v42 = vpack.c.bf16 %v1361_v40, %v1356_v39  ;;  %v1669_v40 = vld [vmem:[#allocation8 + $0xc0] sm:$0xff] }
 0x186   :  { %v3282_v55 = vpop.f32.mrb[0].mxu0  ;;  %v3287_v60 = vpop.f32.mrb[0].mxu1  ;;  %v2740_v43 = vpack.c.bf16 %v1363_v41, %v1358_v47  ;;  %v1670_v47 = vld [vmem:[#allocation8 + $0xc8] sm:$0xff] }
 0x187   :  { %v3285_v59 = vpop.f32.mrb[1].mxu0  ;;  %v3289_v61 = vpop.f32.mrb[1].mxu1  ;;  %v2758_v41 = vpack.c.bf16 %v1670_v47, %v1669_v40 }
 0x188   :  { %2681 = vmatpush1.bf16.msra.mxu0 %v2680_v49  ;;  %2723 = vmatpush1.bf16.msra.mxu1 %v2722_v50 }
 0x189   :  { %2683 = vmatprep.subr.bf16.mxu0 %v2682_v51  ;;  %2724 = vmatprep.subr.bf16.mxu1 %v3066_v28 }
 0x18c   :  { %2685 = vmatpush1.bf16.msra.mxu0 %v2684_v62  ;;  %2726 = vmatpush1.bf16.msra.mxu1 %v2725_v63 }
 0x18d   :  { %2687 = vmatprep.subr.bf16.mxu0 %v2686_v0  ;;  %2727 = vmatprep.subr.bf16.mxu1 %v3066_v28 }
 0x190   :  { %2689 = vmatpush1.bf16.msra.mxu0 %v2688_v7  ;;  %2729 = vmatpush1.bf16.msra.mxu1 %v2728_v8 }
 0x191   :  { %2691 = vmatprep.subr.bf16.mxu0 %v2690_v9  ;;  %2730 = vmatprep.subr.bf16.mxu1 %v3066_v28 }
 0x194   :  { %2693 = vmatpush1.bf16.msra.mxu0 %v2692_v16  ;;  %2732 = vmatpush1.bf16.msra.mxu1 %v2731_v17  ;;  %v2742_v16 = vpack.c.bf16 %v1662_v12, %v1661_v11  ;;  %v1646_v17 = vld [vmem:[#allocation8 + $0x8] sm:$0xff]  ;;  %v1675_v11 = vld [vmem:[#allocation8 + $0xf0] sm:$0xff]  ;;  %v1676_v12 = vld [vmem:[#allocation8 + $0xf8] sm:$0xff] }
 0x195   :  { %2695 = vmatprep.subr.bf16.mxu0 %v2694_v18  ;;  %2733 = vmatprep.subr.bf16.mxu1 %v3066_v28  ;;  %v1663_v18 = vld [vmem:[#allocation8 + $0x90] sm:$0xff]  ;;  %v2744_v21 = vpack.c.bf16 %v1646_v17, %v1645_v13  ;;  %v1660_v17 = vld [vmem:[#allocation8 + $0x78] sm:$0xff] }
 0x196   :  { %v2746_v22 = vpack.c.bf16 %v1664_v19, %v1663_v18 }
 0x198   :  { %2697 = vmatpush1.bf16.msra.mxu0 %v2696_v27  ;;  %2735 = vmatpush1.bf16.msra.mxu1 %v2734_v26  ;;  %v1665_v27 = vld [vmem:[#allocation8 + $0xa0] sm:$0xff]  ;;  %v1666_v26 = vld [vmem:[#allocation8 + $0xa8] sm:$0xff] }
 0x199   :  { %2699 = vmatprep.subr.bf16.mxu0 %v2698_v29  ;;  %2736 = vmatprep.subr.bf16.mxu1 %v3066_v28  ;;  %v2748_v29 = vpack.c.bf16 %v1648_v25, %v1647_v24  ;;  %v2750_v30 = vpack.c.bf16 %v1666_v26, %v1665_v27  ;;  %v116_v26 = vld [vmem:[#allocation7] sm:$0x3] }
 0x19c   :  { %2701 = vmatpush1.bf16.msra.mxu0 %v2700_v36  ;;  %2738 = vmatpush1.bf16.msra.mxu1 %v2737_v37  ;;  %v2754_v36 = vpack.c.bf16 %v1668_v35, %v1667_v33  ;;  %v1651_v37 = vld [vmem:[#allocation8 + $0x30] sm:$0xff] }
 0x19d   :  { %2703 = vmatprep.subr.bf16.mxu0 %v2702_v38  ;;  %2739 = vmatprep.subr.bf16.mxu1 %v3066_v28  ;;  %v1652_v38 = vld [vmem:[#allocation8 + $0x38] sm:$0xff] }
 0x19e   :  { %v2756_v39 = vpack.c.bf16 %v1652_v38, %v1651_v37 }
 0x1a0   :  { %2705 = vmatpush1.bf16.msra.mxu0 %v2704_v42  ;;  %2741 = vmatpush1.bf16.msra.mxu1 %v2740_v43  ;;  %v1653_v42 = vld [vmem:[#allocation8 + $0x40] sm:$0xff]  ;;  %v1654_v43 = vld [vmem:[#allocation8 + $0x48] sm:$0xff] }
 0x1a1   :  { %2743 = vmatprep.subr.bf16.mxu0 %v2742_v16  ;;  %v1659_v16 = vld [vmem:[#allocation8 + $0x70] sm:$0xff] }
 0x1a3   :  { %1500 = vmatmul.mubr.f32.vlgmr.msra.gmra.mrb[10].mxu0 %v3250_v23  ;;  %1571 = vmatmul.mubr.f32.vlgmr.msra.gmra.mrb[10].mxu1 %v3250_v23 }
 0x1a4   :  { %2745 = vmatpush3.bf16.msra.mxu0 %v2744_v21 }
 0x1a5   :  { %2747 = vmatprep.subr.bf16.mxu0 %v2746_v22 }
 0x1a8   :  { %2749 = vmatpush3.bf16.msra.mxu0 %v2748_v29 }
 0x1a9   :  { %2751 = vmatprep.subr.bf16.mxu0 %v2750_v30 }
 0x1ac   :  { %2753 = vmatpush3.bf16.msra.mxu0 %v2752_v34 }
 0x1ad   :  { %2755 = vmatprep.subr.bf16.mxu0 %v2754_v36 }
 0x1b0   :  { %2757 = vmatpush3.bf16.msra.mxu0 %v2756_v39 }
 0x1b1   :  { %2759 = vmatprep.subr.bf16.mxu0 %v2758_v41 }
 0x1b6   :  { %v449_v44 = vpop.f32.mrb[2].mxu0  ;;  %v3299_v46 = vpop.f32.mrb[2].mxu1 }
 0x1b7   :  { %v451_v45 = vpop.f32.mrb[3].mxu0  ;;  %v3301_v48 = vpop.f32.mrb[3].mxu1 }
 0x1b8   :  { %v1671_v45 = vld [vmem:[#allocation8 + $0xd0] sm:$0xff] }
 0x1e6   :  { %v761_v49 = vpop.f32.mrb[4].mxu0  ;;  %v832_v51 = vpop.f32.mrb[4].mxu1 }
 0x1e7   :  { %v763_v50 = vpop.f32.mrb[5].mxu0  ;;  %v834_v52 = vpop.f32.mrb[5].mxu1 }
 0x1e8   :  { %849 = vrot.lane.b32.xlu0 %v763_v50, %s3067_s6  ;;  %v1656_v52 = vld [vmem:[#allocation8 + $0x58] sm:$0xff] }
 0x1ec   :  { %851 = vrot.lane.b32.xlu0 %v832_v51, %s3067_s6  ;;  %v1655_v51 = vld [vmem:[#allocation8 + $0x50] sm:$0xff] }
 0x216   :  { %v3305_v53 = vpop.f32.mrb[6].mxu0  ;;  %v1131_v23 = vpop.f32.mrb[6].mxu1 }
 0x217   :  { %v3307_v54 = vpop.f32.mrb[7].mxu0  ;;  %v1133_v56 = vpop.f32.mrb[7].mxu1 }
 0x218   :  { %1219 = vrot.lane.b32.xlu1 %v1133_v56, %s3067_s6 }
 0x246   :  { %v1202_v57 = vpop.f32.mrb[8].mxu0  ;;  %v3310_v58 = vpop.f32.mrb[8].mxu1 }
 0x247   :  { %1221 = vrot.lane.b32.xlu1 %v1202_v57, %s3067_s6  ;;  %v1204_v62 = vpop.f32.mrb[9].mxu0  ;;  %v3313_v63 = vpop.f32.mrb[9].mxu1  ;;  %v1674_v57 = vld [vmem:[#allocation8 + $0xe8] sm:$0xff] }
 0x25a   :  { %v850_v0 = vpop.permute.xlu0 %849 }
 0x25e   :  { %v852_v5 = vpop.permute.xlu0 %851 }
 0x25f   :  { %v853_v6 = vsel %vm459_vm1, %v850_v0, %v852_v5  ;;  %v857_v8 = vmax.f32 %v763_v50, %v852_v5  ;;  %v1658_v5 = vld [vmem:[#allocation8 + $0x68] sm:$0xff] }
 0x260   :  { %v856_v7 = vmax.f32 %v761_v49, %v853_v6 }
 0x276   :  { %v3315_v1 = vpop.f32.mrb[10].mxu0  ;;  %v1572_v2 = vpop.f32.mrb[10].mxu1 }
 0x277   :  { %v3317_v3 = vpop.f32.mrb[11].mxu0  ;;  %v1574_v4 = vpop.f32.mrb[11].mxu1  ;;  %1591 = vrot.lane.b32.xlu1 %v1572_v2, %s3067_s6 }
 0x278   :  { %1589 = vrot.lane.b32.xlu0 %v3317_v3, %s3067_s6  ;;  %v1657_v4 = vld [vmem:[#allocation8 + $0x60] sm:$0xff] }
 0x27b   :  { %840 = vrot.lane.b32.xlu1 %v761_v49, %s3067_s6  ;;  %v1672_v49 = vld [vmem:[#allocation8 + $0xd8] sm:$0xff] }
 0x27c   :  { %838 = vrot.lane.b32.xlu0 %v3301_v48, %s3067_s6  ;;  %v2762_v50 = vpack.c.bf16 %v1672_v49, %v1671_v45 }
 0x27f   :  { %469 = vrot.lane.b32.xlu1 %v449_v44, %s3067_s6  ;;  %v2760_v44 = vpack.c.bf16 %v1654_v43, %v1653_v42  ;;  %v1693_v42 = vld [vmem:[#allocation8 + $0x180] sm:$0xff]  ;;  %v1694_v43 = vld [vmem:[#allocation8 + $0x188] sm:$0xff] }
 0x280   :  { %467 = vrot.lane.b32.xlu0 %v3289_v61, %s3067_s6  ;;  %v2774_v49 = vpack.c.bf16 %v1694_v43, %v1693_v42  ;;  %v1708_v42 = vld [vmem:[#allocation8 + $0x1f8] sm:$0xff] }
 0x281   :  { %2761 = vmatpush3.bf16.msra.mxu0 %v2760_v44  ;;  %v1677_v44 = vld [vmem:[#allocation8 + $0x100] sm:$0xff] }
 0x282   :  { %2763 = vmatprep.subr.bf16.mxu0 %v2762_v50  ;;  %v1678_v50 = vld [vmem:[#allocation8 + $0x108] sm:$0xff]  ;;  %2775 = vmatprep.subr.bf16.mxu1 %v2774_v49 }
 0x283   :  { %862 = vrot.lane.b32.xlu1 %v857_v8, %s3068_s13  ;;  %v2768_v8 = vpack.c.bf16 %v1658_v5, %v1657_v4 }
 0x284   :  { %860 = vrot.lane.b32.xlu0 %v856_v7, %s3068_s13 }
 0x287   :  { %1210 = vrot.lane.b32.xlu1 %v1131_v23, %s3067_s6 }
 0x288   :  { %1208 = vrot.lane.b32.xlu0 %v3307_v54, %s3067_s6 }
 0x28a   :  { %v1220_v9 = vpop.permute.xlu1 %1219 }
 0x28b   :  { %1580 = vrot.lane.b32.xlu1 %v3315_v1, %s3067_s6 }
 0x28c   :  { %1578 = vrot.lane.b32.xlu0 %v3313_v63, %s3067_s6 }
 0x2b9   :  { %v1222_v10 = vpop.permute.xlu1 %1221 }
 0x2ba   :  { %v1223_v14 = vsel %vm459_vm1, %v1220_v9, %v1222_v10  ;;  %v1227_v15 = vmax.f32 %v1133_v56, %v1222_v10  ;;  %v1673_v56 = vld [vmem:[#allocation8 + $0xe0] sm:$0xff]  ;;  %v489_v10 = vlaneseq }
 0x2bb   :  { %v1226_v20 = vmax.f32 %v1131_v23, %v1223_v14  ;;  %v2764_v23 = vpack.c.bf16 %v1656_v52, %v1655_v51  ;;  %v2766_v2 = vpack.c.bf16 %v1674_v57, %v1673_v56  ;;  %v1695_v51 = vld [vmem:[#allocation8 + $0x190] sm:$0xff]  ;;  %v1696_v52 = vld [vmem:[#allocation8 + $0x198] sm:$0xff]  ;;  %v2776_v56 = vpack.c.bf16 %v1678_v50, %v1677_v44 }
 0x2bc   :  { %1232 = vrot.lane.b32.xlu1 %v1227_v15, %s3068_s13  ;;  %v2770_v15 = vpack.c.bf16 %v1676_v12, %v1675_v11  ;;  %v490_v18 = vshrl.u32 %v489_v10, 7  ;;  %v2778_v57 = vpack.c.bf16 %v1696_v52, %v1695_v51  ;;  %v1681_v12 = vld [vmem:[#allocation8 + $0x120] sm:$0xff]  ;;  %v1691_v44 = vld [vmem:[#allocation8 + $0x170] sm:$0xff] }
 0x2bd   :  { %1230 = vrot.lane.b32.xlu0 %v1226_v20, %s3068_s13  ;;  %2765 = vmatpush3.bf16.msra.mxu0 %v2764_v23 }
 0x2be   :  { %2767 = vmatprep.subr.bf16.mxu0 %v2766_v2  ;;  %v491_v20 = vsub.s32 0, %v490_v18  ;;  %v495_v27 = vsub.s32 1, %v490_v18  ;;  %v1697_v2 = vld [vmem:[#allocation8 + $0x1a0] sm:$0xff]  ;;  %2777 = vmatpush3.bf16.msra.mxu1 %v2776_v56 }
 0x2bf   :  { %2779 = vmatprep.subr.bf16.mxu1 %v2778_v57 }
 0x2c0   :  { %v3359_v34 = vrot.slane %v116_v26, %v491_v20  ;;  %v1701_v20 = vld [vmem:[#allocation8 + $0x1c0] sm:$0xff] }
 0x2c1   :  { %2769 = vmatpush3.bf16.msra.mxu0 %v2768_v8 }
 0x2c2   :  { %2771 = vmatprep.subr.bf16.mxu0 %v2770_v15  ;;  %v1700_v15 = vld [vmem:[#allocation8 + $0x1b8] sm:$0xff] }
 0x2e9   :  { %v1592_v62 = vpop.permute.xlu1 %1591 }
 0x2ea   :  { %v1590_v0 = vpop.permute.xlu0 %1589  ;;  %v1597_v6 = vmax.f32 %v3317_v3, %v1592_v62  ;;  %v2772_v3 = vpack.c.bf16 %v1660_v17, %v1659_v16 }
 0x2eb   :  { %v1593_v7 = vsel %vm459_vm1, %v1590_v0, %v1592_v62  ;;  %v1679_v62 = vld [vmem:[#allocation8 + $0x110] sm:$0xff]  ;;  %v1680_v0 = vld [vmem:[#allocation8 + $0x118] sm:$0xff] }
 0x2ec   :  { %v1596_v9 = vmax.f32 %v3315_v1, %v1593_v7  ;;  %1602 = vrot.lane.b32.xlu1 %v1597_v6, %s3068_s13  ;;  %2773 = vmatpush3.bf16.msra.mxu0 %v2772_v3  ;;  %v1698_v7 = vld [vmem:[#allocation8 + $0x1a8] sm:$0xff] }
 0x2ed   :  { %v841_v13 = vpop.permute.xlu1 %840  ;;  %2806 = vmatprep.subr.bf16.mxu0 %v3066_v28  ;;  %v2782_v11 = vpack.c.bf16 %v1698_v7, %v1697_v2 }
 0x2ee   :  { %1600 = vrot.lane.b32.xlu0 %v1596_v9, %s3068_s13  ;;  %v839_v14 = vpop.permute.xlu0 %838  ;;  %v846_v29 = vmax.f32 %v3301_v48, %v841_v13 }
 0x2ef   :  { %v842_v21 = vsel %vm459_vm1, %v839_v14, %v841_v13  ;;  %v1682_v13 = vld [vmem:[#allocation8 + $0x128] sm:$0xff]  ;;  %v1699_v14 = vld [vmem:[#allocation8 + $0x1b0] sm:$0xff] }
 0x2f0   :  { %455 = vrot.lane.b32.xlu1 %v3285_v59, %s3067_s6  ;;  %v845_v30 = vmax.f32 %v3299_v46, %v842_v21  ;;  %v2786_v18 = vpack.c.bf16 %v1700_v15, %v1699_v14  ;;  %v1702_v21 = vld [vmem:[#allocation8 + $0x1c8] sm:$0xff]  ;;  %v1709_v14 = vld [vmem:[#allocation8 + $0x200] sm:$0xff] }
 0x2f1   :  { %v470_v1 = vpop.permute.xlu1 %469  ;;  %v1710_v15 = vld [vmem:[#allocation8 + $0x208] sm:$0xff] }
 0x2f2   :  { %457 = vrot.lane.b32.xlu0 %v3287_v60, %s3067_s6  ;;  %v468_v19 = vpop.permute.xlu0 %467  ;;  %v475_v24 = vmax.f32 %v3289_v61, %v470_v1  ;;  %v3362_v61 = vrot.slane %v116_v26, %v495_v27  ;;  %v1685_v27 = vld [vmem:[#allocation8 + $0x140] sm:$0xff]  ;;  %v1686_v26 = vld [vmem:[#allocation8 + $0x148] sm:$0xff] }
 0x2f3   :  { %v471_v22 = vsel %vm459_vm1, %v468_v19, %v470_v1  ;;  %v1683_v1 = vld [vmem:[#allocation8 + $0x130] sm:$0xff]  ;;  %v1684_v19 = vld [vmem:[#allocation8 + $0x138] sm:$0xff] }
 0x2f4   :  { %v474_v25 = vmax.f32 %v3287_v60, %v471_v22 }
 0x2f5   :  { %v863_v31 = vpop.permute.xlu1 %862 }
 0x2f6   :  { %480 = vrot.lane.b32.xlu0 %v475_v24, %s3068_s13  ;;  %v861_v32 = vpop.permute.xlu0 %860  ;;  %478 = vrot.lane.b32.xlu1 %v474_v25, %s3068_s13  ;;  %v868_v60 = vmax.f32 %v846_v29, %v863_v31  ;;  %v2788_v24 = vpack.c.bf16 %v1684_v19, %v1683_v1  ;;  %v2790_v25 = vpack.c.bf16 %v1702_v21, %v1701_v20  ;;  %v1703_v29 = vld [vmem:[#allocation8 + $0x1d0] sm:$0xff]  ;;  %v1713_v20 = vld [vmem:[#allocation8 + $0x220] sm:$0xff]  ;;  %v1714_v21 = vld [vmem:[#allocation8 + $0x228] sm:$0xff] }
 0x2f7   :  { %v864_v33 = vsel %vm482_vm2, %v861_v32, %v863_v31  ;;  %v2792_v31 = vpack.c.bf16 %v1686_v26, %v1685_v27 }
 0x2f8   :  { %v867_v35 = vmax.f32 %v845_v30, %v864_v33  ;;  %v870_v48 = vadd.f32 %v868_v60, %v3362_v61  ;;  %v1704_v30 = vld [vmem:[#allocation8 + $0x1d8] sm:$0xff]  ;;  %v1687_v33 = vld [vmem:[#allocation8 + $0x150] sm:$0xff] }
 0x2f9   :  { %v1211_v38 = vpop.permute.xlu1 %1210  ;;  %v2794_v32 = vpack.c.bf16 %v1704_v30, %v1703_v29  ;;  %v1688_v60 = vld [vmem:[#allocation8 + $0x158] sm:$0xff] }
 0x2fa   :  { %v869_v36 = vadd.f32 %v867_v35, %v3359_v34  ;;  %v872_v46 = vmax.f32 %v870_v48, 0.0  ;;  %v1209_v39 = vpop.permute.xlu0 %1208  ;;  %v1216_v45 = vmax.f32 %v3307_v54, %v1211_v38  ;;  %v2780_v54 = vpack.c.bf16 %v1680_v0, %v1679_v62  ;;  %v1705_v35 = vld [vmem:[#allocation8 + $0x1e0] sm:$0xff] }
 0x2fb   :  { %v1212_v41 = vsel %vm459_vm1, %v1209_v39, %v1211_v38  ;;  %v2796_v48 = vpack.c.bf16 %v1688_v60, %v1687_v33  ;;  %v1690_v38 = vld [vmem:[#allocation8 + $0x168] sm:$0xff] }
 0x2fc   :  { %v871_v37 = vmax.f32 %v869_v36, 0.0  ;;  %v1215_v4 = vmax.f32 %v3305_v53, %v1212_v41  ;;  %2781 = vmatpush3.bf16.msra.mxu1 %v2780_v54  ;;  %v2784_v53 = vpack.c.bf16 %v1682_v13, %v1681_v12  ;;  %v1706_v36 = vld [vmem:[#allocation8 + $0x1e8] sm:$0xff]  ;;  %v1707_v41 = vld [vmem:[#allocation8 + $0x1f0] sm:$0xff] }
 0x2fd   :  { %v3366_v40 = vpop.permute.xlu1 %1580  ;;  %2783 = vmatprep.subr.bf16.mxu1 %v2782_v11  ;;  %v2802_v43 = vpack.c.bf16 %v1708_v42, %v1707_v41  ;;  %v1941_v42 = vld [vmem:[#allocation11 + $0x20] sm:$0xff] }
 0x2fe   :  { %1615 = vrot.lane.b32.xlu0 %v871_v37, %s3069_s14  ;;  %v3368_v47 = vpop.permute.xlu0 %1578  ;;  %v2798_v37 = vpack.c.bf16 %v1706_v36, %v1705_v35  ;;  %v1586_v51 = vmax.f32 %v3313_v63, %v3366_v40 }
 0x2ff   :  { %v1582_v50 = vsel %vm459_vm1, %v3368_v47, %v3366_v40 }
 0x300   :  { %2785 = vmatpush3.bf16.msra.mxu1 %v2784_v53 }
 0x301   :  { %2787 = vmatprep.subr.bf16.mxu1 %v2786_v18  ;;  %v1712_v18 = vld [vmem:[#allocation8 + $0x218] sm:$0xff] }
 0x302   :  { %1617 = vrot.lane.b32.xlu0 %v872_v46, %s3069_s14  ;;  %v1689_v46 = vld [vmem:[#allocation8 + $0x160] sm:$0xff] }
 0x303   :  { %v2800_v39 = vpack.c.bf16 %v1690_v38, %v1689_v46  ;;  %v1939_v46 = vld [vmem:[#allocation11 + $0x10] sm:$0xff]  ;;  %v1940_v38 = vld [vmem:[#allocation11 + $0x18] sm:$0xff] }
 0x304   :  { %2789 = vmatpush3.bf16.msra.mxu1 %v2788_v24  ;;  %v1715_v24 = vld [vmem:[#allocation8 + $0x230] sm:$0xff]  ;;  %v2822_v41 = vpack.c.bf16 %v1940_v38, %v1939_v46 }
 0x305   :  { %2791 = vmatprep.subr.bf16.mxu1 %v2790_v25  ;;  %v1716_v25 = vld [vmem:[#allocation8 + $0x238] sm:$0xff] }
 0x306   :  { %v2816_v27 = vpack.c.bf16 %v1716_v25, %v1715_v24 }
 0x308   :  { %2793 = vmatpush3.bf16.msra.mxu1 %v2792_v31  ;;  %v1937_v31 = vld [vmem:[#allocation11] sm:$0xff] }
 0x309   :  { %2795 = vmatprep.subr.bf16.mxu1 %v2794_v32  ;;  %v1938_v32 = vld [vmem:[#allocation11 + $0x8] sm:$0xff] }
 0x30a   :  { %v2819_v36 = vpack.c.bf16 %v1938_v32, %v1937_v31 }
 0x30c   :  { %2797 = vmatpush3.bf16.msra.mxu1 %v2796_v48 }
 0x30d   :  { %2799 = vmatprep.subr.bf16.mxu1 %v2798_v37 }
 0x310   :  { %2801 = vmatpush3.bf16.msra.mxu1 %v2800_v39 }
 0x311   :  { %2803 = vmatprep.subr.bf16.mxu1 %v2802_v43  ;;  %v1942_v43 = vld [vmem:[#allocation11 + $0x28] sm:$0xff] }
 0x32e   :  { %v1233_v23 = vpop.permute.xlu1 %1232 }
 0x32f   :  { %v1238_v5 = vmax.f32 %v1216_v45, %v1233_v23  ;;  %v1231_v6 = vpop.permute.xlu0 %1230  ;;  %v1692_v45 = vld [vmem:[#allocation8 + $0x178] sm:$0xff] }
 0x330   :  { %v1234_v8 = vsel %vm482_vm2, %v1231_v6, %v1233_v23  ;;  %v2804_v49 = vpack.c.bf16 %v1692_v45, %v1691_v44  ;;  %v1585_v23 = vmax.f32 %v3310_v58, %v1582_v50  ;;  %v2825_v44 = vpack.c.bf16 %v1942_v43, %v1941_v42  ;;  %v1943_v45 = vld [vmem:[#allocation11 + $0x30] sm:$0xff] }
 0x331   :  { %v1240_v9 = vadd.f32 %v1238_v5, %v3362_v61  ;;  %v1237_v10 = vmax.f32 %v1215_v4, %v1234_v8 }
 0x332   :  { %2805 = vmatpush3.bf16.msra.mxu1 %v2804_v49  ;;  %v1944_v49 = vld [vmem:[#allocation11 + $0x38] sm:$0xff] }
 0x333   :  { %v1239_v16 = vadd.f32 %v1237_v10, %v3359_v34  ;;  %v1242_v17 = vmax.f32 %v1240_v9, 0.0  ;;  %2818 = vmatprep.subr.bf16.mxu1 %v3066_v28  ;;  %v2828_v50 = vpack.c.bf16 %v1944_v49, %v1943_v45 }
 0x335   :  { %v1241_v3 = vmax.f32 %v1239_v16, 0.0 }
 0x337   :  { %v2862_v22 = vpack.i.bf16 %v1242_v17, %v1241_v3  ;;  %v2807_v17 = vpack.c.bf16 %v1710_v15, %v1709_v14  ;;  %v1711_v3 = vld [vmem:[#allocation8 + $0x210] sm:$0xff] }
 0x338   :  { %v2810_v19 = vpack.c.bf16 %v1712_v18, %v1711_v3 }
 0x339   :  { %2863 = vrot.lane.b32.xlu1 %v2862_v22, %s3070_s0  ;;  %v2813_v22 = vpack.c.bf16 %v1714_v21, %v1713_v20 }
 0x35e   :  { %v1603_v52 = vpop.permute.xlu1 %1602 }
 0x35f   :  { %v1608_v56 = vmax.f32 %v1586_v51, %v1603_v52  ;;  %v1945_v51 = vld [vmem:[#allocation11 + $0x40] sm:$0xff] }
 0x360   :  { %v1601_v57 = vpop.permute.xlu0 %1600 }
 0x361   :  { %v1604_v62 = vsel %vm482_vm2, %v1601_v57, %v1603_v52  ;;  %v1610_v0 = vadd.f32 %v1608_v56, %v3362_v61  ;;  %v1946_v52 = vld [vmem:[#allocation11 + $0x48] sm:$0xff]  ;;  %v1947_v56 = vld [vmem:[#allocation11 + $0x50] sm:$0xff]  ;;  %v1948_v57 = vld [vmem:[#allocation11 + $0x58] sm:$0xff] }
 0x362   :  { %v1607_v2 = vmax.f32 %v1585_v23, %v1604_v62  ;;  %v456_v4 = vpop.permute.xlu1 %455  ;;  %v2831_v23 = vpack.c.bf16 %v1946_v52, %v1945_v51  ;;  %v2834_v62 = vpack.c.bf16 %v1948_v57, %v1947_v56 }
 0x363   :  { %v1612_v6 = vmax.f32 %v1610_v0, 0.0  ;;  %v1949_v0 = vld [vmem:[#allocation11 + $0x60] sm:$0xff] }
 0x364   :  { %v458_v5 = vpop.permute.xlu0 %457  ;;  %v1609_v7 = vadd.f32 %v1607_v2, %v3359_v34  ;;  %v1950_v2 = vld [vmem:[#allocation11 + $0x68] sm:$0xff] }
 0x365   :  { %v460_v47 = vsel %vm459_vm1, %v456_v4, %v458_v5  ;;  %1637 = vrot.lane.b32.xlu0 %v1612_v6, %s3071_s8  ;;  %v464_v40 = vmax.f32 %v3285_v59, %v458_v5  ;;  %v2837_v4 = vpack.c.bf16 %v1950_v2, %v1949_v0  ;;  %v1951_v5 = vld [vmem:[#allocation11 + $0x70] sm:$0xff]  ;;  %v1952_v6 = vld [vmem:[#allocation11 + $0x78] sm:$0xff] }
 0x366   :  { %v1611_v63 = vmax.f32 %v1609_v7, 0.0  ;;  %v463_v58 = vmax.f32 %v3282_v55, %v460_v47  ;;  %v2840_v7 = vpack.c.bf16 %v1952_v6, %v1951_v5 }
 0x368   :  { %v481_v8 = vpop.permute.xlu0 %480  ;;  %1635 = vrot.lane.b32.xlu1 %v1611_v63, %s3071_s8  ;;  %v479_v54 = vpop.permute.xlu1 %478 }
 0x369   :  { %v487_v9 = vmax.f32 %v464_v40, %v481_v8  ;;  %v483_v10 = vsel %vm482_vm2, %v479_v54, %v481_v8 }
 0x36a   :  { %v486_v11 = vmax.f32 %v463_v58, %v483_v10  ;;  %v2061_v58 = vld [vmem:[#allocation10] ss:$0 sm:$0xff] }
 0x36b   :  { %v500_v12 = vadd.f32 %v3362_v61, %v487_v9  ;;  %v3073_v61 = vmov 0.0  }
 0x36c   :  { %v499_v13 = vadd.f32 %v3359_v34, %v486_v11 }
 0x36d   :  { %v502_v16 = vmax.f32 %v500_v12, 0.0 }
 0x36e   :  { %v501_v59 = vmax.f32 %v499_v13, 0.0 }
 0x370   :  { %v1616_v53 = vpop.permute.xlu0 %1615 }
 0x371   :  { %v1642_v55 = vsel %vm1619_vm3, %v502_v16, %v1616_v53  ;;  %v2063_v16 = vld [vmem:[#allocation13] ss:$0 sm:$0xff] }
 0x372   :  { %1790 = vmatprep.mubr.f32.mxu0 %v1642_v55 }
 0x373   :  { %1791 = vmatmul.mubr.f32.vlgmr.msra.gmra.mrb[12].mxu0 %v501_v59 }
 0x374   :  { %v1618_v1 = vpop.permute.xlu0 %1617  ;;  %2808 = vmatpush3.bf16.msra.mxu0 %v2807_v17  ;;  %2176 = vmatprep.mubr.msk.f32.mxu0 %vm3072_vm4, %v3073_v61 }
 0x375   :  { %v1620_v34 = vsel %vm1619_vm3, %v1616_v53, %v1618_v1  ;;  %2809 = vmatprep.subr.bf16.mxu0 %v3066_v28 }
 0x378   :  { %2811 = vmatpush3.bf16.msra.mxu0 %v2810_v19 }
 0x379   :  { %2812 = vmatprep.subr.bf16.mxu0 %v3066_v28 }
 0x37c   :  { %2814 = vmatpush3.bf16.msra.mxu0 %v2813_v22 }
 0x37d   :  { %2815 = vmatprep.subr.bf16.mxu0 %v3066_v28 }
 0x380   :  { %2817 = vmatpush3.bf16.msra.mxu0 %v2816_v27 }
 0x3ab   :  { %v2864_v26 = vpop.permute.xlu1 %2863 }
 0x3ac   :  { %v2866_v29 = vunpack.i.h.bf16 %v2864_v26  ;;  %v2865_v30 = vunpack.i.l.bf16 %v2864_v26 }
 0x3ae   :  { %v1630_v35 = vsel %vm1629_vm5, %v2865_v30, %v2866_v29  ;;  %v1643_v39 = vsel %vm1629_vm5, %v1620_v34, %v2865_v30 }
 0x3d7   :  { %v1638_v33 = vpop.permute.xlu0 %1637 }
 0x3da   :  { %v1636_v60 = vpop.permute.xlu1 %1635 }
 0x3db   :  { %v1640_v48 = vsel %vm1639_vm6, %v1636_v60, %v1638_v33  ;;  %v1644_v37 = vsel %vm1639_vm6, %v1630_v35, %v1636_v60 }
 0x3dc   :  { %1860 = vmatprep.mubr.f32.mxu1 %v1644_v37  ;;  %2177 = vmatmul.mubr.msk.f32.vlgmr.msra.gmra.mrb[14].mxu0 %vm237_vm0, %v1640_v48 }
 0x3dd   :  { %1861 = vmatmul.mubr.f32.vlgmr.msra.gmra.mrb[12].mxu1 %v1643_v39 }
 0x3de   :  { %2820 = vmatpush3.bf16.msra.mxu1 %v2819_v36  ;;  %2211 = vmatprep.mubr.msk.f32.mxu1 %vm3072_vm4, %v3073_v61 }
 0x3df   :  { %2821 = vmatprep.subr.bf16.mxu1 %v3066_v28 }
 0x3e2   :  { %2823 = vmatpush3.bf16.msra.mxu1 %v2822_v41 }
 0x3e3   :  { %2824 = vmatprep.subr.bf16.mxu1 %v3066_v28 }
 0x3e6   :  { %2826 = vmatpush3.bf16.msra.mxu1 %v2825_v44 }
 0x3e7   :  { %2827 = vmatprep.subr.bf16.mxu1 %v3066_v28 }
 0x3ea   :  { %2829 = vmatpush3.bf16.msra.mxu1 %v2828_v50 }
 0x3eb   :  { %2830 = vmatprep.subr.bf16.mxu1 %v3066_v28 }
 0x3ee   :  { %2832 = vmatpush3.bf16.msra.mxu1 %v2831_v23 }
 0x3ef   :  { %2833 = vmatprep.subr.bf16.mxu1 %v3066_v28 }
 0x3f2   :  { %2835 = vmatpush3.bf16.msra.mxu1 %v2834_v62 }
 0x3f3   :  { %2836 = vmatprep.subr.bf16.mxu1 %v3066_v28 }
 0x3f6   :  { %2838 = vmatpush3.bf16.msra.mxu1 %v2837_v4 }
 0x3f7   :  { %2839 = vmatprep.subr.bf16.mxu1 %v3066_v28 }
 0x3fa   :  { %2841 = vmatpush3.bf16.msra.mxu1 %v2840_v7 }
 0x446   :  { %v2096_v47 = vpop.f32.mrb[12].mxu0 }
 0x447   :  { %v2097_v63 = vpop.f32.mrb[13].mxu0 }
 0x448   :  { %v2098_v40 = vadd.f32 %v2097_v63, %v2096_v47 }
 0x44a   :  { %v1793_v11 = vadd.f32 %v2098_v40, %v2061_v58 }
 0x4af   :  { %v1932_v8 = vpop.f32.mrb[14].mxu0 }
 0x4b0   :  { %v2131_v54 = vpop.f32.mrb[12].mxu1  ;;  %v2178_v9 = vpop.f32.mrb[15].mxu0 }
 0x4b1   :  { %v2132_v10 = vpop.f32.mrb[13].mxu1 }
 0x4b2   :  { %v2133_v12 = vadd.f32 %v2132_v10, %v2131_v54 }
 0x4b4   :  { %v1863_v13 = vadd.f32 %v2133_v12, %v1793_v11 }
 0x4b6   :  { %v1933_v14 = vadd.f32 %v1932_v8, %v1863_v13 }
 0x4b8   :  { %v1936_v15 = vmax.f32 %v1933_v14, 0.0 }
 0x4ba   :  { %2212 = vmatmul.mubr.f32.vlgmr.msra.gmra.mrb[14].mxu1 %v1936_v15 }
 0x58d   :  { %v2026_v28 = vpop.f32.mrb[14].mxu1 }
 0x58e   :  { %v2027_v53 = vadd.f32 %v2063_v16, %v2026_v28  ;;  %v2213_v17 = vpop.f32.mrb[15].mxu1 }
 0x590   :  { %2030 = vst [vmem:[#allocation14] sm:$0xff] %v2027_v53 }
 0x591   :  { %3034 = shalt.err (!%p3031_p4)
}
 0x592   :  { %s3035_s19 = scalar_lea.hbm %s3426_s7, 128 }
 0x593   :  { %p3036_p5 = scmp.ne.s32.totalorder %s3426_s7, %s3035_s19  ;;  %p3039_p6 = scmp.lt.u32.totalorder %s3035_s19, %s3426_s7 }
 0x595   :  { %p3041_p7 = pnand %p3039_p6, %p3036_p5 }
 0x597   :  { %3044 = shalt.err (!%p3041_p7)
}
 0x598   :  { %2040 = dma.vmem_to_hbm [thread:$0]  %s2038_s3, 128, %s3426_s7, [#allocation4]  }
 0x599   :  { %3053 = dma.done.wait [#allocation4], 128  }
 0x59a   :  { %3054 = vsyncadd [#allocation4], 4294967168 }
 0x59b   :  { %2044 = vsyncpa [#allocation3], 1 }
 0x59c   :  { %2045 = vsyncpa [#allocation6], 1 }
 0x59d   :  { %2046 = vsyncpa [#allocation9], 1 }
 0x59e   :  { %2047 = vsyncpa [#allocation12], 1 }
 0x59f   :  { %2048 = vsyncpa [#allocation4], 1 }

</bundles_post_ra>
